<compile_context>
chip_gen: v6e
topology: v6e:2x2x1
jax: 0.10.0
libtpu: 0.0.40
codegen_flags: <defaults>
</compile_context>

<pallas_src>
import functools

import jax
import jax.numpy as jnp
from jax import lax
from jax.experimental import pallas as pl
from jax.experimental.pallas import tpu as pltpu


# ---------------------------------------------------------------------------
# Fused decoder kernel: input projection + LSTM recurrence + FC projection,
# processing `t_block` time steps per grid iteration.
# ---------------------------------------------------------------------------
def _decoder_fused_kernel(emb_ref, w_ih_ref, b_ref, w_hh_ref, w_fc_ref, b_fc_ref,
                          h0_ref, c0_ref,
                          pred_ref, h_state_ref, c_state_ref,
                          gx_ref, hblk_ref,
                          *, t_block, unroll):
    B = h_state_ref.shape[0]
    H = h_state_ref.shape[-1]
    E = emb_ref.shape[-1]
    V = pred_ref.shape[-1]
    mm_dtype = w_hh_ref.dtype

    # h_state_ref / c_state_ref have constant output block indices, so they stay
    # resident in VMEM across the whole grid and serve as the running state.
    @pl.when(pl.program_id(0) == 0)
    def _():
        h_state_ref[...] = h0_ref[...]
        c_state_ref[...] = c0_ref[...]

    # (1) Hoisted input projection for the whole time block (one MXU matmul),
    #     staged in f32 VMEM scratch -- never written to HBM.
    emb = emb_ref[...].reshape(t_block * B, E)                     # (t_block*B, E)
    gx = jnp.dot(emb, w_ih_ref[...],
                 preferred_element_type=jnp.float32) + b_ref[...]  # (t_block*B, 4H)
    gx_ref[...] = gx.reshape(t_block, B, 4 * H)

    # (2) Serial recurrence: only h_{t-1} @ W_hh stays on the critical path.
    #     State is carried as values; per-step hidden states are staged in VMEM.
    def step(i, carry):
        h_prev, c_prev = carry                                     # (B, H) f32
        gates = gx_ref[i] + jnp.dot(
            h_prev.astype(mm_dtype), w_hh_ref[...],
            preferred_element_type=jnp.float32)                    # (B, 4H) f32

        # PyTorch gate order: i, f, g, o.  Gate math kept in f32
        # (v5e has no bf16 VPU/EUP).
        i_g = jax.nn.sigmoid(gates[:, 0 * H:1 * H])
        f_g = jax.nn.sigmoid(gates[:, 1 * H:2 * H])
        g_g = jnp.tanh(gates[:, 2 * H:3 * H])
        o_g = jax.nn.sigmoid(gates[:, 3 * H:4 * H])

        c_new = f_g * c_prev + i_g * g_g
        h_new = o_g * jnp.tanh(c_new)
        hblk_ref[i] = h_new                                        # f32 VMEM staging
        return h_new, c_new

    h_fin, c_fin = lax.fori_loop(
        0, t_block, step, (h_state_ref[...], c_state_ref[...]), unroll=unroll)
    h_state_ref[...] = h_fin
    c_state_ref[...] = c_fin

    # (3) Hoisted output projection for the whole block (one MXU matmul).
    h_all = hblk_ref[...].reshape(t_block * B, H).astype(mm_dtype)
    pred = jnp.dot(h_all, w_fc_ref[...],
                   preferred_element_type=jnp.float32) + b_fc_ref[...]  # (t_block*B, V)
    pred = pred.reshape(t_block, B, V)
    # (t, b, v) -> (b, t, v): a few block-wide stores (one per batch row) instead
    # of one masked partial store per time step.  B is small here.
    # TODO(synk): for large B switch to a single jnp.transpose / einshape.
    for b_idx in range(B):
        pred_ref[b_idx] = pred[:, b_idx, :].astype(pred_ref.dtype)


def _pick_time_block(seq_len, max_block=32):
    """Number of LSTM steps handled per grid iteration.

    The prediction output block is (B, t_block, V), so t_block (its sublane dim)
    must be a multiple of 8 or equal to the full sequence length.
    """
    if seq_len <= max_block:
        return seq_len
    for cand in range(max_block, 7, -8):
        if seq_len % cand == 0:
            return cand
    # TODO(synk): pad S (with per-step state masking) instead of this whole-
    # sequence fallback; a single resident (S, B, 4H) block can exceed v7x's
    # 64 MiB VMEM for very long, divisor-free sequence lengths.
    return seq_len


# ---------------------------------------------------------------------------
# Decoder forward pass.
# ---------------------------------------------------------------------------
@functools.partial(jax.jit, static_argnames=("matmul_dtype",))
def decoder_forward(x, hidden, cell, params, matmul_dtype=jnp.bfloat16):
    """Pallas-backed forward pass of the Decoder module.

    x: (B, S) int32, hidden/cell: (1, B, H) f32.
    Returns (prediction (B, S, V), hidden (1, B, H), cell (1, B, H)).
    """
    emb_table = params["embedding"]                    # (V, E)
    w_ih = params["w_ih"].astype(matmul_dtype)         # (E, 4H)
    w_hh = params["w_hh"].astype(matmul_dtype)         # (H, 4H)
    b = params["b"]                                    # (1, 4H) f32 (b_ih + b_hh)
    w_fc = params["w_fc"].astype(matmul_dtype)         # (H, V)
    b_fc = params["b_fc"]                              # (1, V) f32

    B, S = x.shape
    E = emb_table.shape[1]
    H = params["w_hh"].shape[0]
    V = params["w_fc"].shape[1]

    # Embedding gather, time-major (S, B, E): indexing with x.T means no
    # materialized activation transpose.  (bf16 cast here; drift risk for very
    # long sequences is only through the per-step h cast, state stays f32.)
    embedded = jnp.take(emb_table, x.T, axis=0).astype(matmul_dtype)   # (S, B, E)

    h0 = hidden[0].astype(jnp.float32)                 # (B, H)
    c0 = cell[0].astype(jnp.float32)                   # (B, H)

    t_block = _pick_time_block(S)
    n_blocks = S // t_block
    unroll = True if t_block <= 8 else 8

    kernel = functools.partial(_decoder_fused_kernel, t_block=t_block, unroll=unroll)

    pred, h_out, c_out = pl.pallas_call(
        kernel,
        out_shape=(
            jax.ShapeDtypeStruct((B, S, V), jnp.float32),    # prediction
            jax.ShapeDtypeStruct((B, H), jnp.float32),       # final hidden
            jax.ShapeDtypeStruct((B, H), jnp.float32),       # final cell
        ),
        grid_spec=pltpu.PrefetchScalarGridSpec(
            num_scalar_prefetch=0,
            grid=(n_blocks,),
            in_specs=[
                pl.BlockSpec((t_block, B, E), lambda tb: (tb, 0, 0)),   # embedded
                pl.BlockSpec((E, 4 * H), lambda tb: (0, 0)),            # w_ih
                pl.BlockSpec((1, 4 * H), lambda tb: (0, 0)),            # b
                pl.BlockSpec((H, 4 * H), lambda tb: (0, 0)),            # w_hh
                pl.BlockSpec((H, V), lambda tb: (0, 0)),                # w_fc
                pl.BlockSpec((1, V), lambda tb: (0, 0)),                # b_fc
                pl.BlockSpec((B, H), lambda tb: (0, 0)),                # h0
                pl.BlockSpec((B, H), lambda tb: (0, 0)),                # c0
            ],
            out_specs=[
                pl.BlockSpec((B, t_block, V), lambda tb: (0, tb, 0)),   # prediction
                pl.BlockSpec((B, H), lambda tb: (0, 0)),                # final h
                pl.BlockSpec((B, H), lambda tb: (0, 0)),                # final c
            ],
            scratch_shapes=[
                pltpu.VMEM((t_block, B, 4 * H), jnp.float32),   # gates_x staging
                pltpu.VMEM((t_block, B, H), jnp.float32),       # hidden staging
            ],
        ),
        compiler_params=pltpu.CompilerParams(
            dimension_semantics=("arbitrary",),   # sequential recurrence over time
            vmem_limit_bytes=32 * 1024 * 1024,    # safe on v5e/v6e/v7x
        ),
    )(embedded, w_ih, b, w_hh, w_fc, b_fc, h0, c0)

    return pred, h_out[None], c_out[None]


# ---------------------------------------------------------------------------
# Pure-JAX reference (PyTorch LSTM semantics) and parameter init.
# ---------------------------------------------------------------------------
def decoder_reference(x, hidden, cell, params):
    emb = params["embedding"]
    w_ih, w_hh, b = params["w_ih"], params["w_hh"], params["b"]
    w_fc, b_fc = params["w_fc"], params["b_fc"]
    B, S = x.shape
    H = w_hh.shape[0]
    embedded = jnp.take(emb, x, axis=0)                # (B, S, E)
    h, c = hidden[0], cell[0]
    hs = []
    for t in range(S):
        gates = embedded[:, t, :] @ w_ih + h @ w_hh + b
        i_g = jax.nn.sigmoid(gates[:, 0 * H:1 * H])
        f_g = jax.nn.sigmoid(gates[:, 1 * H:2 * H])
        g_g = jnp.tanh(gates[:, 2 * H:3 * H])
        o_g = jax.nn.sigmoid(gates[:, 3 * H:4 * H])
        c = f_g * c + i_g * g_g
        h = o_g * jnp.tanh(c)
        hs.append(h)
    h_all = jnp.stack(hs, axis=1)                      # (B, S, H)
    pred = h_all @ w_fc + b_fc
    return pred, h[None], c[None]


def init_params(key, output_dim, embed_dim, hidden_dim):
    """PyTorch LSTM stores W_ih (4H, E) / W_hh (4H, H); we keep them transposed so
    the kernel computes x @ W_ih + h @ W_hh.  b_ih + b_hh are folded into one bias."""
    k1, k2, k3, k4, k5, k6 = jax.random.split(key, 6)
    s = 1.0 / jnp.sqrt(hidden_dim)
    return {
        "embedding": jax.random.normal(k1, (output_dim, embed_dim), jnp.float32),
        "w_ih": jax.random.uniform(k2, (embed_dim, 4 * hidden_dim), jnp.float32, -s, s),
        "w_hh": jax.random.uniform(k3, (hidden_dim, 4 * hidden_dim), jnp.float32, -s, s),
        "b": jax.random.uniform(k4, (1, 4 * hidden_dim), jnp.float32, -s, s),
        "w_fc": jax.random.uniform(k5, (hidden_dim, output_dim), jnp.float32, -s, s),
        "b_fc": jax.random.uniform(k6, (1, output_dim), jnp.float32, -s, s),
    }


if __name__ == "__main__":
    # vocab (output_dim) = 16, embed = 32, hidden = 32, num_layers = 1
    B, S = 2, 8
    OUTPUT_DIM, EMBED_DIM, HIDDEN_DIM = 16, 32, 32

    key = jax.random.PRNGKey(0)
    k_params, k_x, k_h, k_c = jax.random.split(key, 4)

    params = init_params(k_params, OUTPUT_DIM, EMBED_DIM, HIDDEN_DIM)

    x = jax.random.randint(k_x, (B, S), 0, OUTPUT_DIM, dtype=jnp.int32)
    hidden = jax.random.normal(k_h, (1, B, HIDDEN_DIM), jnp.float32)
    cell = jax.random.normal(k_c, (1, B, HIDDEN_DIM), jnp.float32)

    ref_pred, ref_h, ref_c = decoder_reference(x, hidden, cell, params)

    # Exact-precision run (f32 MXU operands): tight check against the reference.
    pred32, h32, c32 = decoder_forward(x, hidden, cell, params,
                                       matmul_dtype=jnp.float32)
    jax.block_until_ready((pred32, h32, c32))
    assert pred32.shape == (B, S, OUTPUT_DIM)
    assert h32.shape == (1, B, HIDDEN_DIM) and c32.shape == (1, B, HIDDEN_DIM)
    assert float(jnp.max(jnp.abs(pred32 - ref_pred))) < 1e-3
    assert float(jnp.max(jnp.abs(h32 - ref_h))) < 1e-3
    assert float(jnp.max(jnp.abs(c32 - ref_c))) < 1e-3

    # Performance default (bf16 MXU operands, f32 state, staging & accumulation).
    prediction, h_out, c_out = decoder_forward(x, hidden, cell, params)
    jax.block_until_ready((prediction, h_out, c_out))
    assert prediction.shape == (B, S, OUTPUT_DIM)
    assert h_out.shape == (1, B, HIDDEN_DIM) and c_out.shape == (1, B, HIDDEN_DIM)
    assert float(jnp.max(jnp.abs(prediction - ref_pred))) < 7.5e-2
    assert float(jnp.max(jnp.abs(h_out - ref_h))) < 7.5e-2
    assert float(jnp.max(jnp.abs(c_out - ref_c))) < 7.5e-2

    print("KERNEL_OK")
</pallas_src>

<mosaic_0001>
module attributes {stable_mosaic.version = 11 : i64} {
  func.func @_decoder_fused_kernel(%arg0: i32, %arg1: memref<8x2x32xf32, #tpu.memory_space<vmem>>, %arg2: memref<32x128xf32, #tpu.memory_space<vmem>>, %arg3: memref<1x128xf32, #tpu.memory_space<vmem>>, %arg4: memref<32x128xf32, #tpu.memory_space<vmem>>, %arg5: memref<32x16xf32, #tpu.memory_space<vmem>>, %arg6: memref<1x16xf32, #tpu.memory_space<vmem>>, %arg7: memref<2x32xf32, #tpu.memory_space<vmem>>, %arg8: memref<2x32xf32, #tpu.memory_space<vmem>>, %arg9: memref<2x8x16xf32, #tpu.memory_space<vmem>>, %arg10: memref<2x32xf32, #tpu.memory_space<vmem>>, %arg11: memref<2x32xf32, #tpu.memory_space<vmem>>, %arg12: memref<8x2x128xf32, #tpu.memory_space<vmem>>, %arg13: memref<8x2x32xf32, #tpu.memory_space<vmem>>) attributes {dimension_semantics = [#tpu.dimension_semantics<arbitrary>], iteration_bounds = array<i64: 1>, scalar_prefetch = 0 : i64, scratch_operands = 2 : i64, tpu.core_type = #tpu.core_type<tc>, window_params = [{transform_indices = @transform_0, window_bounds = array<i64: 8, 2, 32>}, {pipeline_mode = #tpu.pipeline_mode<synchronous>, transform_indices = @transform_1, window_bounds = array<i64: 32, 128>}, {pipeline_mode = #tpu.pipeline_mode<synchronous>, transform_indices = @transform_2, window_bounds = array<i64: 1, 128>}, {pipeline_mode = #tpu.pipeline_mode<synchronous>, transform_indices = @transform_3, window_bounds = array<i64: 32, 128>}, {pipeline_mode = #tpu.pipeline_mode<synchronous>, transform_indices = @transform_4, window_bounds = array<i64: 32, 16>}, {pipeline_mode = #tpu.pipeline_mode<synchronous>, transform_indices = @transform_5, window_bounds = array<i64: 1, 16>}, {pipeline_mode = #tpu.pipeline_mode<synchronous>, transform_indices = @transform_6, window_bounds = array<i64: 2, 32>}, {pipeline_mode = #tpu.pipeline_mode<synchronous>, transform_indices = @transform_7, window_bounds = array<i64: 2, 32>}, {transform_indices = @transform_8, window_bounds = array<i64: 2, 8, 16>}, {pipeline_mode = #tpu.pipeline_mode<synchronous>, transform_indices = @transform_9, window_bounds = array<i64: 2, 32>}, {pipeline_mode = #tpu.pipeline_mode<synchronous>, transform_indices = @transform_10, window_bounds = array<i64: 2, 32>}]} {
    %c0_i32 = arith.constant 0 : i32
    %0 = arith.cmpi eq, %arg0, %c0_i32 : i32
    %1 = arith.extui %0 : i1 to i32
    %c0_i32_0 = arith.constant 0 : i32
    %2 = arith.cmpi ne, %1, %c0_i32_0 : i32
    scf.if %2 {
      %c0_112 = arith.constant 0 : index
      %c0_113 = arith.constant 0 : index
      %314 = vector.load %arg7[%c0_112, %c0_113] : memref<2x32xf32, #tpu.memory_space<vmem>>, vector<2x32xf32>
      %c0_114 = arith.constant 0 : index
      %c0_115 = arith.constant 0 : index
      %315 = vector.load %arg10[%c0_114, %c0_115] : memref<2x32xf32, #tpu.memory_space<vmem>>, vector<2x32xf32>
      tpu.vector_store %arg10[%c0_114, %c0_115], %314 {strides = array<i32>} : memref<2x32xf32, #tpu.memory_space<vmem>>, vector<2x32xf32>,
      %c0_116 = arith.constant 0 : index
      %c0_117 = arith.constant 0 : index
      %316 = vector.load %arg8[%c0_116, %c0_117] : memref<2x32xf32, #tpu.memory_space<vmem>>, vector<2x32xf32>
      %c0_118 = arith.constant 0 : index
      %c0_119 = arith.constant 0 : index
      %317 = vector.load %arg11[%c0_118, %c0_119] : memref<2x32xf32, #tpu.memory_space<vmem>>, vector<2x32xf32>
      tpu.vector_store %arg11[%c0_118, %c0_119], %316 {strides = array<i32>} : memref<2x32xf32, #tpu.memory_space<vmem>>, vector<2x32xf32>,
    } else {
    }
    %c0 = arith.constant 0 : index
    %c0_1 = arith.constant 0 : index
    %c0_2 = arith.constant 0 : index
    %3 = vector.load %arg1[%c0, %c0_1, %c0_2] : memref<8x2x32xf32, #tpu.memory_space<vmem>>, vector<8x2x32xf32>
    %4 = vector.shape_cast %3 : vector<8x2x32xf32> to vector<16x32xf32>
    %c0_3 = arith.constant 0 : index
    %c0_4 = arith.constant 0 : index
    %5 = vector.load %arg2[%c0_3, %c0_4] : memref<32x128xf32, #tpu.memory_space<vmem>>, vector<32x128xf32>
    %cst = arith.constant dense<0.000000e+00> : vector<16x128xf32>
    %6 = tpu.matmul %4, %5, %cst {dimension_numbers = #tpu.dot_dimension_numbers<[1], [0], [0], [1], [0, 0, 1, 1], [], []>} : vector<16x32xf32>, vector<32x128xf32>, vector<16x128xf32> -> vector<16x128xf32>
    %c0_5 = arith.constant 0 : index
    %c0_6 = arith.constant 0 : index
    %7 = vector.load %arg3[%c0_5, %c0_6] : memref<1x128xf32, #tpu.memory_space<vmem>>, vector<1x128xf32>
    %8 = vector.broadcast %7 : vector<1x128xf32> to vector<16x128xf32>
    %9 = arith.addf %6, %8 : vector<16x128xf32>
    %10 = vector.shape_cast %9 : vector<16x128xf32> to vector<8x2x128xf32>
    %c0_7 = arith.constant 0 : index
    %c0_8 = arith.constant 0 : index
    %c0_9 = arith.constant 0 : index
    %11 = vector.load %arg12[%c0_7, %c0_8, %c0_9] : memref<8x2x128xf32, #tpu.memory_space<vmem>>, vector<8x2x128xf32>
    tpu.vector_store %arg12[%c0_7, %c0_8, %c0_9], %10 {strides = array<i32>} : memref<8x2x128xf32, #tpu.memory_space<vmem>>, vector<8x2x128xf32>,
    %c0_10 = arith.constant 0 : index
    %c0_11 = arith.constant 0 : index
    %12 = vector.load %arg10[%c0_10, %c0_11] : memref<2x32xf32, #tpu.memory_space<vmem>>, vector<2x32xf32>
    %c0_12 = arith.constant 0 : index
    %c0_13 = arith.constant 0 : index
    %13 = vector.load %arg11[%c0_12, %c0_13] : memref<2x32xf32, #tpu.memory_space<vmem>>, vector<2x32xf32>
    %c0_i32_14 = arith.constant 0 : i32
    %14 = arith.index_cast %c0_i32_14 : i32 to index
    %c0_15 = arith.constant 0 : index
    %c0_16 = arith.constant 0 : index
    %15 = vector.load %arg12[%14, %c0_15, %c0_16] : memref<8x2x128xf32, #tpu.memory_space<vmem>>, vector<1x2x128xf32>
    %16 = vector.shape_cast %15 : vector<1x2x128xf32> to vector<2x128xf32>
    %c0_17 = arith.constant 0 : index
    %c0_18 = arith.constant 0 : index
    %17 = vector.load %arg4[%c0_17, %c0_18] : memref<32x128xf32, #tpu.memory_space<vmem>>, vector<32x128xf32>
    %cst_19 = arith.constant dense<0.000000e+00> : vector<2x128xf32>
    %18 = tpu.matmul %12, %17, %cst_19 {dimension_numbers = #tpu.dot_dimension_numbers<[1], [0], [0], [1], [0, 0, 1, 1], [], []>} : vector<2x32xf32>, vector<32x128xf32>, vector<2x128xf32> -> vector<2x128xf32>
    %19 = arith.addf %16, %18 : vector<2x128xf32>
    %20 = vector.extract_strided_slice %19 {offsets = [0, 0], sizes = [2, 32], strides = [1, 1]} : vector<2x128xf32> to vector<2x32xf32>
    %21 = arith.negf %20 : vector<2x32xf32>
    %22 = math.exp %21 : vector<2x32xf32>
    %cst_20 = arith.constant 1.000000e+00 : f32
    %23 = vector.broadcast %cst_20 : f32 to vector<2x32xf32>
    %24 = arith.addf %23, %22 : vector<2x32xf32>
    %25 = arith.divf %23, %24 : vector<2x32xf32>
    %26 = vector.extract_strided_slice %19 {offsets = [0, 32], sizes = [2, 32], strides = [1, 1]} : vector<2x128xf32> to vector<2x32xf32>
    %27 = arith.negf %26 : vector<2x32xf32>
    %28 = math.exp %27 : vector<2x32xf32>
    %cst_21 = arith.constant 1.000000e+00 : f32
    %29 = vector.broadcast %cst_21 : f32 to vector<2x32xf32>
    %30 = arith.addf %29, %28 : vector<2x32xf32>
    %31 = arith.divf %29, %30 : vector<2x32xf32>
    %32 = vector.extract_strided_slice %19 {offsets = [0, 64], sizes = [2, 32], strides = [1, 1]} : vector<2x128xf32> to vector<2x32xf32>
    %33 = math.tanh %32 : vector<2x32xf32>
    %34 = vector.extract_strided_slice %19 {offsets = [0, 96], sizes = [2, 32], strides = [1, 1]} : vector<2x128xf32> to vector<2x32xf32>
    %35 = arith.negf %34 : vector<2x32xf32>
    %36 = math.exp %35 : vector<2x32xf32>
    %cst_22 = arith.constant 1.000000e+00 : f32
    %37 = vector.broadcast %cst_22 : f32 to vector<2x32xf32>
    %38 = arith.addf %37, %36 : vector<2x32xf32>
    %39 = arith.divf %37, %38 : vector<2x32xf32>
    %40 = arith.mulf %31, %13 : vector<2x32xf32>
    %41 = arith.mulf %25, %33 : vector<2x32xf32>
    %42 = arith.addf %40, %41 : vector<2x32xf32>
    %43 = math.tanh %42 : vector<2x32xf32>
    %44 = arith.mulf %39, %43 : vector<2x32xf32>
    %45 = arith.index_cast %c0_i32_14 : i32 to index
    %c0_23 = arith.constant 0 : index
    %c0_24 = arith.constant 0 : index
    %46 = vector.load %arg13[%45, %c0_23, %c0_24] : memref<8x2x32xf32, #tpu.memory_space<vmem>>, vector<1x2x32xf32>
    %47 = vector.shape_cast %46 : vector<1x2x32xf32> to vector<2x32xf32>
    %48 = vector.shape_cast %44 : vector<2x32xf32> to vector<1x2x32xf32>
    tpu.vector_store %arg13[%45, %c0_23, %c0_24], %48 {strides = array<i32>} : memref<8x2x32xf32, #tpu.memory_space<vmem>>, vector<1x2x32xf32>,
    %c1_i32 = arith.constant 1 : i32
    %49 = arith.index_cast %c1_i32 : i32 to index
    %c0_25 = arith.constant 0 : index
    %c0_26 = arith.constant 0 : index
    %50 = vector.load %arg12[%49, %c0_25, %c0_26] : memref<8x2x128xf32, #tpu.memory_space<vmem>>, vector<1x2x128xf32>
    %51 = vector.shape_cast %50 : vector<1x2x128xf32> to vector<2x128xf32>
    %c0_27 = arith.constant 0 : index
    %c0_28 = arith.constant 0 : index
    %52 = vector.load %arg4[%c0_27, %c0_28] : memref<32x128xf32, #tpu.memory_space<vmem>>, vector<32x128xf32>
    %cst_29 = arith.constant dense<0.000000e+00> : vector<2x128xf32>
    %53 = tpu.matmul %44, %52, %cst_29 {dimension_numbers = #tpu.dot_dimension_numbers<[1], [0], [0], [1], [0, 0, 1, 1], [], []>} : vector<2x32xf32>, vector<32x128xf32>, vector<2x128xf32> -> vector<2x128xf32>
    %54 = arith.addf %51, %53 : vector<2x128xf32>
    %55 = vector.extract_strided_slice %54 {offsets = [0, 0], sizes = [2, 32], strides = [1, 1]} : vector<2x128xf32> to vector<2x32xf32>
    %56 = arith.negf %55 : vector<2x32xf32>
    %57 = math.exp %56 : vector<2x32xf32>
    %cst_30 = arith.constant 1.000000e+00 : f32
    %58 = vector.broadcast %cst_30 : f32 to vector<2x32xf32>
    %59 = arith.addf %58, %57 : vector<2x32xf32>
    %60 = arith.divf %58, %59 : vector<2x32xf32>
    %61 = vector.extract_strided_slice %54 {offsets = [0, 32], sizes = [2, 32], strides = [1, 1]} : vector<2x128xf32> to vector<2x32xf32>
    %62 = arith.negf %61 : vector<2x32xf32>
    %63 = math.exp %62 : vector<2x32xf32>
    %cst_31 = arith.constant 1.000000e+00 : f32
    %64 = vector.broadcast %cst_31 : f32 to vector<2x32xf32>
    %65 = arith.addf %64, %63 : vector<2x32xf32>
    %66 = arith.divf %64, %65 : vector<2x32xf32>
    %67 = vector.extract_strided_slice %54 {offsets = [0, 64], sizes = [2, 32], strides = [1, 1]} : vector<2x128xf32> to vector<2x32xf32>
    %68 = math.tanh %67 : vector<2x32xf32>
    %69 = vector.extract_strided_slice %54 {offsets = [0, 96], sizes = [2, 32], strides = [1, 1]} : vector<2x128xf32> to vector<2x32xf32>
    %70 = arith.negf %69 : vector<2x32xf32>
    %71 = math.exp %70 : vector<2x32xf32>
    %cst_32 = arith.constant 1.000000e+00 : f32
    %72 = vector.broadcast %cst_32 : f32 to vector<2x32xf32>
    %73 = arith.addf %72, %71 : vector<2x32xf32>
    %74 = arith.divf %72, %73 : vector<2x32xf32>
    %75 = arith.mulf %66, %42 : vector<2x32xf32>
    %76 = arith.mulf %60, %68 : vector<2x32xf32>
    %77 = arith.addf %75, %76 : vector<2x32xf32>
    %78 = math.tanh %77 : vector<2x32xf32>
    %79 = arith.mulf %74, %78 : vector<2x32xf32>
    %80 = arith.index_cast %c1_i32 : i32 to index
    %c0_33 = arith.constant 0 : index
    %c0_34 = arith.constant 0 : index
    %81 = vector.load %arg13[%80, %c0_33, %c0_34] : memref<8x2x32xf32, #tpu.memory_space<vmem>>, vector<1x2x32xf32>
    %82 = vector.shape_cast %81 : vector<1x2x32xf32> to vector<2x32xf32>
    %83 = vector.shape_cast %79 : vector<2x32xf32> to vector<1x2x32xf32>
    tpu.vector_store %arg13[%80, %c0_33, %c0_34], %83 {strides = array<i32>} : memref<8x2x32xf32, #tpu.memory_space<vmem>>, vector<1x2x32xf32>,
    %c2_i32 = arith.constant 2 : i32
    %84 = arith.index_cast %c2_i32 : i32 to index
    %c0_35 = arith.constant 0 : index
    %c0_36 = arith.constant 0 : index
    %85 = vector.load %arg12[%84, %c0_35, %c0_36] : memref<8x2x128xf32, #tpu.memory_space<vmem>>, vector<1x2x128xf32>
    %86 = vector.shape_cast %85 : vector<1x2x128xf32> to vector<2x128xf32>
    %c0_37 = arith.constant 0 : index
    %c0_38 = arith.constant 0 : index
    %87 = vector.load %arg4[%c0_37, %c0_38] : memref<32x128xf32, #tpu.memory_space<vmem>>, vector<32x128xf32>
    %cst_39 = arith.constant dense<0.000000e+00> : vector<2x128xf32>
    %88 = tpu.matmul %79, %87, %cst_39 {dimension_numbers = #tpu.dot_dimension_numbers<[1], [0], [0], [1], [0, 0, 1, 1], [], []>} : vector<2x32xf32>, vector<32x128xf32>, vector<2x128xf32> -> vector<2x128xf32>
    %89 = arith.addf %86, %88 : vector<2x128xf32>
    %90 = vector.extract_strided_slice %89 {offsets = [0, 0], sizes = [2, 32], strides = [1, 1]} : vector<2x128xf32> to vector<2x32xf32>
    %91 = arith.negf %90 : vector<2x32xf32>
    %92 = math.exp %91 : vector<2x32xf32>
    %cst_40 = arith.constant 1.000000e+00 : f32
    %93 = vector.broadcast %cst_40 : f32 to vector<2x32xf32>
    %94 = arith.addf %93, %92 : vector<2x32xf32>
    %95 = arith.divf %93, %94 : vector<2x32xf32>
    %96 = vector.extract_strided_slice %89 {offsets = [0, 32], sizes = [2, 32], strides = [1, 1]} : vector<2x128xf32> to vector<2x32xf32>
    %97 = arith.negf %96 : vector<2x32xf32>
    %98 = math.exp %97 : vector<2x32xf32>
    %cst_41 = arith.constant 1.000000e+00 : f32
    %99 = vector.broadcast %cst_41 : f32 to vector<2x32xf32>
    %100 = arith.addf %99, %98 : vector<2x32xf32>
    %101 = arith.divf %99, %100 : vector<2x32xf32>
    %102 = vector.extract_strided_slice %89 {offsets = [0, 64], sizes = [2, 32], strides = [1, 1]} : vector<2x128xf32> to vector<2x32xf32>
    %103 = math.tanh %102 : vector<2x32xf32>
    %104 = vector.extract_strided_slice %89 {offsets = [0, 96], sizes = [2, 32], strides = [1, 1]} : vector<2x128xf32> to vector<2x32xf32>
    %105 = arith.negf %104 : vector<2x32xf32>
    %106 = math.exp %105 : vector<2x32xf32>
    %cst_42 = arith.constant 1.000000e+00 : f32
    %107 = vector.broadcast %cst_42 : f32 to vector<2x32xf32>
    %108 = arith.addf %107, %106 : vector<2x32xf32>
    %109 = arith.divf %107, %108 : vector<2x32xf32>
    %110 = arith.mulf %101, %77 : vector<2x32xf32>
    %111 = arith.mulf %95, %103 : vector<2x32xf32>
    %112 = arith.addf %110, %111 : vector<2x32xf32>
    %113 = math.tanh %112 : vector<2x32xf32>
    %114 = arith.mulf %109, %113 : vector<2x32xf32>
    %115 = arith.index_cast %c2_i32 : i32 to index
    %c0_43 = arith.constant 0 : index
    %c0_44 = arith.constant 0 : index
    %116 = vector.load %arg13[%115, %c0_43, %c0_44] : memref<8x2x32xf32, #tpu.memory_space<vmem>>, vector<1x2x32xf32>
    %117 = vector.shape_cast %116 : vector<1x2x32xf32> to vector<2x32xf32>
    %118 = vector.shape_cast %114 : vector<2x32xf32> to vector<1x2x32xf32>
    tpu.vector_store %arg13[%115, %c0_43, %c0_44], %118 {strides = array<i32>} : memref<8x2x32xf32, #tpu.memory_space<vmem>>, vector<1x2x32xf32>,
    %c3_i32 = arith.constant 3 : i32
    %119 = arith.index_cast %c3_i32 : i32 to index
    %c0_45 = arith.constant 0 : index
    %c0_46 = arith.constant 0 : index
    %120 = vector.load %arg12[%119, %c0_45, %c0_46] : memref<8x2x128xf32, #tpu.memory_space<vmem>>, vector<1x2x128xf32>
    %121 = vector.shape_cast %120 : vector<1x2x128xf32> to vector<2x128xf32>
    %c0_47 = arith.constant 0 : index
    %c0_48 = arith.constant 0 : index
    %122 = vector.load %arg4[%c0_47, %c0_48] : memref<32x128xf32, #tpu.memory_space<vmem>>, vector<32x128xf32>
    %cst_49 = arith.constant dense<0.000000e+00> : vector<2x128xf32>
    %123 = tpu.matmul %114, %122, %cst_49 {dimension_numbers = #tpu.dot_dimension_numbers<[1], [0], [0], [1], [0, 0, 1, 1], [], []>} : vector<2x32xf32>, vector<32x128xf32>, vector<2x128xf32> -> vector<2x128xf32>
    %124 = arith.addf %121, %123 : vector<2x128xf32>
    %125 = vector.extract_strided_slice %124 {offsets = [0, 0], sizes = [2, 32], strides = [1, 1]} : vector<2x128xf32> to vector<2x32xf32>
    %126 = arith.negf %125 : vector<2x32xf32>
    %127 = math.exp %126 : vector<2x32xf32>
    %cst_50 = arith.constant 1.000000e+00 : f32
    %128 = vector.broadcast %cst_50 : f32 to vector<2x32xf32>
    %129 = arith.addf %128, %127 : vector<2x32xf32>
    %130 = arith.divf %128, %129 : vector<2x32xf32>
    %131 = vector.extract_strided_slice %124 {offsets = [0, 32], sizes = [2, 32], strides = [1, 1]} : vector<2x128xf32> to vector<2x32xf32>
    %132 = arith.negf %131 : vector<2x32xf32>
    %133 = math.exp %132 : vector<2x32xf32>
    %cst_51 = arith.constant 1.000000e+00 : f32
    %134 = vector.broadcast %cst_51 : f32 to vector<2x32xf32>
    %135 = arith.addf %134, %133 : vector<2x32xf32>
    %136 = arith.divf %134, %135 : vector<2x32xf32>
    %137 = vector.extract_strided_slice %124 {offsets = [0, 64], sizes = [2, 32], strides = [1, 1]} : vector<2x128xf32> to vector<2x32xf32>
    %138 = math.tanh %137 : vector<2x32xf32>
    %139 = vector.extract_strided_slice %124 {offsets = [0, 96], sizes = [2, 32], strides = [1, 1]} : vector<2x128xf32> to vector<2x32xf32>
    %140 = arith.negf %139 : vector<2x32xf32>
    %141 = math.exp %140 : vector<2x32xf32>
    %cst_52 = arith.constant 1.000000e+00 : f32
    %142 = vector.broadcast %cst_52 : f32 to vector<2x32xf32>
    %143 = arith.addf %142, %141 : vector<2x32xf32>
    %144 = arith.divf %142, %143 : vector<2x32xf32>
    %145 = arith.mulf %136, %112 : vector<2x32xf32>
    %146 = arith.mulf %130, %138 : vector<2x32xf32>
    %147 = arith.addf %145, %146 : vector<2x32xf32>
    %148 = math.tanh %147 : vector<2x32xf32>
    %149 = arith.mulf %144, %148 : vector<2x32xf32>
    %150 = arith.index_cast %c3_i32 : i32 to index
    %c0_53 = arith.constant 0 : index
    %c0_54 = arith.constant 0 : index
    %151 = vector.load %arg13[%150, %c0_53, %c0_54] : memref<8x2x32xf32, #tpu.memory_space<vmem>>, vector<1x2x32xf32>
    %152 = vector.shape_cast %151 : vector<1x2x32xf32> to vector<2x32xf32>
    %153 = vector.shape_cast %149 : vector<2x32xf32> to vector<1x2x32xf32>
    tpu.vector_store %arg13[%150, %c0_53, %c0_54], %153 {strides = array<i32>} : memref<8x2x32xf32, #tpu.memory_space<vmem>>, vector<1x2x32xf32>,
    %c4_i32 = arith.constant 4 : i32
    %154 = arith.index_cast %c4_i32 : i32 to index
    %c0_55 = arith.constant 0 : index
    %c0_56 = arith.constant 0 : index
    %155 = vector.load %arg12[%154, %c0_55, %c0_56] : memref<8x2x128xf32, #tpu.memory_space<vmem>>, vector<1x2x128xf32>
    %156 = vector.shape_cast %155 : vector<1x2x128xf32> to vector<2x128xf32>
    %c0_57 = arith.constant 0 : index
    %c0_58 = arith.constant 0 : index
    %157 = vector.load %arg4[%c0_57, %c0_58] : memref<32x128xf32, #tpu.memory_space<vmem>>, vector<32x128xf32>
    %cst_59 = arith.constant dense<0.000000e+00> : vector<2x128xf32>
    %158 = tpu.matmul %149, %157, %cst_59 {dimension_numbers = #tpu.dot_dimension_numbers<[1], [0], [0], [1], [0, 0, 1, 1], [], []>} : vector<2x32xf32>, vector<32x128xf32>, vector<2x128xf32> -> vector<2x128xf32>
    %159 = arith.addf %156, %158 : vector<2x128xf32>
    %160 = vector.extract_strided_slice %159 {offsets = [0, 0], sizes = [2, 32], strides = [1, 1]} : vector<2x128xf32> to vector<2x32xf32>
    %161 = arith.negf %160 : vector<2x32xf32>
    %162 = math.exp %161 : vector<2x32xf32>
    %cst_60 = arith.constant 1.000000e+00 : f32
    %163 = vector.broadcast %cst_60 : f32 to vector<2x32xf32>
    %164 = arith.addf %163, %162 : vector<2x32xf32>
    %165 = arith.divf %163, %164 : vector<2x32xf32>
    %166 = vector.extract_strided_slice %159 {offsets = [0, 32], sizes = [2, 32], strides = [1, 1]} : vector<2x128xf32> to vector<2x32xf32>
    %167 = arith.negf %166 : vector<2x32xf32>
    %168 = math.exp %167 : vector<2x32xf32>
    %cst_61 = arith.constant 1.000000e+00 : f32
    %169 = vector.broadcast %cst_61 : f32 to vector<2x32xf32>
    %170 = arith.addf %169, %168 : vector<2x32xf32>
    %171 = arith.divf %169, %170 : vector<2x32xf32>
    %172 = vector.extract_strided_slice %159 {offsets = [0, 64], sizes = [2, 32], strides = [1, 1]} : vector<2x128xf32> to vector<2x32xf32>
    %173 = math.tanh %172 : vector<2x32xf32>
    %174 = vector.extract_strided_slice %159 {offsets = [0, 96], sizes = [2, 32], strides = [1, 1]} : vector<2x128xf32> to vector<2x32xf32>
    %175 = arith.negf %174 : vector<2x32xf32>
    %176 = math.exp %175 : vector<2x32xf32>
    %cst_62 = arith.constant 1.000000e+00 : f32
    %177 = vector.broadcast %cst_62 : f32 to vector<2x32xf32>
    %178 = arith.addf %177, %176 : vector<2x32xf32>
    %179 = arith.divf %177, %178 : vector<2x32xf32>
    %180 = arith.mulf %171, %147 : vector<2x32xf32>
    %181 = arith.mulf %165, %173 : vector<2x32xf32>
    %182 = arith.addf %180, %181 : vector<2x32xf32>
    %183 = math.tanh %182 : vector<2x32xf32>
    %184 = arith.mulf %179, %183 : vector<2x32xf32>
    %185 = arith.index_cast %c4_i32 : i32 to index
    %c0_63 = arith.constant 0 : index
    %c0_64 = arith.constant 0 : index
    %186 = vector.load %arg13[%185, %c0_63, %c0_64] : memref<8x2x32xf32, #tpu.memory_space<vmem>>, vector<1x2x32xf32>
    %187 = vector.shape_cast %186 : vector<1x2x32xf32> to vector<2x32xf32>
    %188 = vector.shape_cast %184 : vector<2x32xf32> to vector<1x2x32xf32>
    tpu.vector_store %arg13[%185, %c0_63, %c0_64], %188 {strides = array<i32>} : memref<8x2x32xf32, #tpu.memory_space<vmem>>, vector<1x2x32xf32>,
    %c5_i32 = arith.constant 5 : i32
    %189 = arith.index_cast %c5_i32 : i32 to index
    %c0_65 = arith.constant 0 : index
    %c0_66 = arith.constant 0 : index
    %190 = vector.load %arg12[%189, %c0_65, %c0_66] : memref<8x2x128xf32, #tpu.memory_space<vmem>>, vector<1x2x128xf32>
    %191 = vector.shape_cast %190 : vector<1x2x128xf32> to vector<2x128xf32>
    %c0_67 = arith.constant 0 : index
    %c0_68 = arith.constant 0 : index
    %192 = vector.load %arg4[%c0_67, %c0_68] : memref<32x128xf32, #tpu.memory_space<vmem>>, vector<32x128xf32>
    %cst_69 = arith.constant dense<0.000000e+00> : vector<2x128xf32>
    %193 = tpu.matmul %184, %192, %cst_69 {dimension_numbers = #tpu.dot_dimension_numbers<[1], [0], [0], [1], [0, 0, 1, 1], [], []>} : vector<2x32xf32>, vector<32x128xf32>, vector<2x128xf32> -> vector<2x128xf32>
    %194 = arith.addf %191, %193 : vector<2x128xf32>
    %195 = vector.extract_strided_slice %194 {offsets = [0, 0], sizes = [2, 32], strides = [1, 1]} : vector<2x128xf32> to vector<2x32xf32>
    %196 = arith.negf %195 : vector<2x32xf32>
    %197 = math.exp %196 : vector<2x32xf32>
    %cst_70 = arith.constant 1.000000e+00 : f32
    %198 = vector.broadcast %cst_70 : f32 to vector<2x32xf32>
    %199 = arith.addf %198, %197 : vector<2x32xf32>
    %200 = arith.divf %198, %199 : vector<2x32xf32>
    %201 = vector.extract_strided_slice %194 {offsets = [0, 32], sizes = [2, 32], strides = [1, 1]} : vector<2x128xf32> to vector<2x32xf32>
    %202 = arith.negf %201 : vector<2x32xf32>
    %203 = math.exp %202 : vector<2x32xf32>
    %cst_71 = arith.constant 1.000000e+00 : f32
    %204 = vector.broadcast %cst_71 : f32 to vector<2x32xf32>
    %205 = arith.addf %204, %203 : vector<2x32xf32>
    %206 = arith.divf %204, %205 : vector<2x32xf32>
    %207 = vector.extract_strided_slice %194 {offsets = [0, 64], sizes = [2, 32], strides = [1, 1]} : vector<2x128xf32> to vector<2x32xf32>
    %208 = math.tanh %207 : vector<2x32xf32>
    %209 = vector.extract_strided_slice %194 {offsets = [0, 96], sizes = [2, 32], strides = [1, 1]} : vector<2x128xf32> to vector<2x32xf32>
    %210 = arith.negf %209 : vector<2x32xf32>
    %211 = math.exp %210 : vector<2x32xf32>
    %cst_72 = arith.constant 1.000000e+00 : f32
    %212 = vector.broadcast %cst_72 : f32 to vector<2x32xf32>
    %213 = arith.addf %212, %211 : vector<2x32xf32>
    %214 = arith.divf %212, %213 : vector<2x32xf32>
    %215 = arith.mulf %206, %182 : vector<2x32xf32>
    %216 = arith.mulf %200, %208 : vector<2x32xf32>
    %217 = arith.addf %215, %216 : vector<2x32xf32>
    %218 = math.tanh %217 : vector<2x32xf32>
    %219 = arith.mulf %214, %218 : vector<2x32xf32>
    %220 = arith.index_cast %c5_i32 : i32 to index
    %c0_73 = arith.constant 0 : index
    %c0_74 = arith.constant 0 : index
    %221 = vector.load %arg13[%220, %c0_73, %c0_74] : memref<8x2x32xf32, #tpu.memory_space<vmem>>, vector<1x2x32xf32>
    %222 = vector.shape_cast %221 : vector<1x2x32xf32> to vector<2x32xf32>
    %223 = vector.shape_cast %219 : vector<2x32xf32> to vector<1x2x32xf32>
    tpu.vector_store %arg13[%220, %c0_73, %c0_74], %223 {strides = array<i32>} : memref<8x2x32xf32, #tpu.memory_space<vmem>>, vector<1x2x32xf32>,
    %c6_i32 = arith.constant 6 : i32
    %224 = arith.index_cast %c6_i32 : i32 to index
    %c0_75 = arith.constant 0 : index
    %c0_76 = arith.constant 0 : index
    %225 = vector.load %arg12[%224, %c0_75, %c0_76] : memref<8x2x128xf32, #tpu.memory_space<vmem>>, vector<1x2x128xf32>
    %226 = vector.shape_cast %225 : vector<1x2x128xf32> to vector<2x128xf32>
    %c0_77 = arith.constant 0 : index
    %c0_78 = arith.constant 0 : index
    %227 = vector.load %arg4[%c0_77, %c0_78] : memref<32x128xf32, #tpu.memory_space<vmem>>, vector<32x128xf32>
    %cst_79 = arith.constant dense<0.000000e+00> : vector<2x128xf32>
    %228 = tpu.matmul %219, %227, %cst_79 {dimension_numbers = #tpu.dot_dimension_numbers<[1], [0], [0], [1], [0, 0, 1, 1], [], []>} : vector<2x32xf32>, vector<32x128xf32>, vector<2x128xf32> -> vector<2x128xf32>
    %229 = arith.addf %226, %228 : vector<2x128xf32>
    %230 = vector.extract_strided_slice %229 {offsets = [0, 0], sizes = [2, 32], strides = [1, 1]} : vector<2x128xf32> to vector<2x32xf32>
    %231 = arith.negf %230 : vector<2x32xf32>
    %232 = math.exp %231 : vector<2x32xf32>
    %cst_80 = arith.constant 1.000000e+00 : f32
    %233 = vector.broadcast %cst_80 : f32 to vector<2x32xf32>
    %234 = arith.addf %233, %232 : vector<2x32xf32>
    %235 = arith.divf %233, %234 : vector<2x32xf32>
    %236 = vector.extract_strided_slice %229 {offsets = [0, 32], sizes = [2, 32], strides = [1, 1]} : vector<2x128xf32> to vector<2x32xf32>
    %237 = arith.negf %236 : vector<2x32xf32>
    %238 = math.exp %237 : vector<2x32xf32>
    %cst_81 = arith.constant 1.000000e+00 : f32
    %239 = vector.broadcast %cst_81 : f32 to vector<2x32xf32>
    %240 = arith.addf %239, %238 : vector<2x32xf32>
    %241 = arith.divf %239, %240 : vector<2x32xf32>
    %242 = vector.extract_strided_slice %229 {offsets = [0, 64], sizes = [2, 32], strides = [1, 1]} : vector<2x128xf32> to vector<2x32xf32>
    %243 = math.tanh %242 : vector<2x32xf32>
    %244 = vector.extract_strided_slice %229 {offsets = [0, 96], sizes = [2, 32], strides = [1, 1]} : vector<2x128xf32> to vector<2x32xf32>
    %245 = arith.negf %244 : vector<2x32xf32>
    %246 = math.exp %245 : vector<2x32xf32>
    %cst_82 = arith.constant 1.000000e+00 : f32
    %247 = vector.broadcast %cst_82 : f32 to vector<2x32xf32>
    %248 = arith.addf %247, %246 : vector<2x32xf32>
    %249 = arith.divf %247, %248 : vector<2x32xf32>
    %250 = arith.mulf %241, %217 : vector<2x32xf32>
    %251 = arith.mulf %235, %243 : vector<2x32xf32>
    %252 = arith.addf %250, %251 : vector<2x32xf32>
    %253 = math.tanh %252 : vector<2x32xf32>
    %254 = arith.mulf %249, %253 : vector<2x32xf32>
    %255 = arith.index_cast %c6_i32 : i32 to index
    %c0_83 = arith.constant 0 : index
    %c0_84 = arith.constant 0 : index
    %256 = vector.load %arg13[%255, %c0_83, %c0_84] : memref<8x2x32xf32, #tpu.memory_space<vmem>>, vector<1x2x32xf32>
    %257 = vector.shape_cast %256 : vector<1x2x32xf32> to vector<2x32xf32>
    %258 = vector.shape_cast %254 : vector<2x32xf32> to vector<1x2x32xf32>
    tpu.vector_store %arg13[%255, %c0_83, %c0_84], %258 {strides = array<i32>} : memref<8x2x32xf32, #tpu.memory_space<vmem>>, vector<1x2x32xf32>,
    %c7_i32 = arith.constant 7 : i32
    %259 = arith.index_cast %c7_i32 : i32 to index
    %c0_85 = arith.constant 0 : index
    %c0_86 = arith.constant 0 : index
    %260 = vector.load %arg12[%259, %c0_85, %c0_86] : memref<8x2x128xf32, #tpu.memory_space<vmem>>, vector<1x2x128xf32>
    %261 = vector.shape_cast %260 : vector<1x2x128xf32> to vector<2x128xf32>
    %c0_87 = arith.constant 0 : index
    %c0_88 = arith.constant 0 : index
    %262 = vector.load %arg4[%c0_87, %c0_88] : memref<32x128xf32, #tpu.memory_space<vmem>>, vector<32x128xf32>
    %cst_89 = arith.constant dense<0.000000e+00> : vector<2x128xf32>
    %263 = tpu.matmul %254, %262, %cst_89 {dimension_numbers = #tpu.dot_dimension_numbers<[1], [0], [0], [1], [0, 0, 1, 1], [], []>} : vector<2x32xf32>, vector<32x128xf32>, vector<2x128xf32> -> vector<2x128xf32>
    %264 = arith.addf %261, %263 : vector<2x128xf32>
    %265 = vector.extract_strided_slice %264 {offsets = [0, 0], sizes = [2, 32], strides = [1, 1]} : vector<2x128xf32> to vector<2x32xf32>
    %266 = arith.negf %265 : vector<2x32xf32>
    %267 = math.exp %266 : vector<2x32xf32>
    %cst_90 = arith.constant 1.000000e+00 : f32
    %268 = vector.broadcast %cst_90 : f32 to vector<2x32xf32>
    %269 = arith.addf %268, %267 : vector<2x32xf32>
    %270 = arith.divf %268, %269 : vector<2x32xf32>
    %271 = vector.extract_strided_slice %264 {offsets = [0, 32], sizes = [2, 32], strides = [1, 1]} : vector<2x128xf32> to vector<2x32xf32>
    %272 = arith.negf %271 : vector<2x32xf32>
    %273 = math.exp %272 : vector<2x32xf32>
    %cst_91 = arith.constant 1.000000e+00 : f32
    %274 = vector.broadcast %cst_91 : f32 to vector<2x32xf32>
    %275 = arith.addf %274, %273 : vector<2x32xf32>
    %276 = arith.divf %274, %275 : vector<2x32xf32>
    %277 = vector.extract_strided_slice %264 {offsets = [0, 64], sizes = [2, 32], strides = [1, 1]} : vector<2x128xf32> to vector<2x32xf32>
    %278 = math.tanh %277 : vector<2x32xf32>
    %279 = vector.extract_strided_slice %264 {offsets = [0, 96], sizes = [2, 32], strides = [1, 1]} : vector<2x128xf32> to vector<2x32xf32>
    %280 = arith.negf %279 : vector<2x32xf32>
    %281 = math.exp %280 : vector<2x32xf32>
    %cst_92 = arith.constant 1.000000e+00 : f32
    %282 = vector.broadcast %cst_92 : f32 to vector<2x32xf32>
    %283 = arith.addf %282, %281 : vector<2x32xf32>
    %284 = arith.divf %282, %283 : vector<2x32xf32>
    %285 = arith.mulf %276, %252 : vector<2x32xf32>
    %286 = arith.mulf %270, %278 : vector<2x32xf32>
    %287 = arith.addf %285, %286 : vector<2x32xf32>
    %288 = math.tanh %287 : vector<2x32xf32>
    %289 = arith.mulf %284, %288 : vector<2x32xf32>
    %290 = arith.index_cast %c7_i32 : i32 to index
    %c0_93 = arith.constant 0 : index
    %c0_94 = arith.constant 0 : index
    %291 = vector.load %arg13[%290, %c0_93, %c0_94] : memref<8x2x32xf32, #tpu.memory_space<vmem>>, vector<1x2x32xf32>
    %292 = vector.shape_cast %291 : vector<1x2x32xf32> to vector<2x32xf32>
    %293 = vector.shape_cast %289 : vector<2x32xf32> to vector<1x2x32xf32>
    tpu.vector_store %arg13[%290, %c0_93, %c0_94], %293 {strides = array<i32>} : memref<8x2x32xf32, #tpu.memory_space<vmem>>, vector<1x2x32xf32>,
    %c8_i32 = arith.constant 8 : i32
    %c0_95 = arith.constant 0 : index
    %c0_96 = arith.constant 0 : index
    %294 = vector.load %arg10[%c0_95, %c0_96] : memref<2x32xf32, #tpu.memory_space<vmem>>, vector<2x32xf32>
    tpu.vector_store %arg10[%c0_95, %c0_96], %289 {strides = array<i32>} : memref<2x32xf32, #tpu.memory_space<vmem>>, vector<2x32xf32>,
    %c0_97 = arith.constant 0 : index
    %c0_98 = arith.constant 0 : index
    %295 = vector.load %arg11[%c0_97, %c0_98] : memref<2x32xf32, #tpu.memory_space<vmem>>, vector<2x32xf32>
    tpu.vector_store %arg11[%c0_97, %c0_98], %287 {strides = array<i32>} : memref<2x32xf32, #tpu.memory_space<vmem>>, vector<2x32xf32>,
    %c0_99 = arith.constant 0 : index
    %c0_100 = arith.constant 0 : index
    %c0_101 = arith.constant 0 : index
    %296 = vector.load %arg13[%c0_99, %c0_100, %c0_101] : memref<8x2x32xf32, #tpu.memory_space<vmem>>, vector<8x2x32xf32>
    %297 = vector.shape_cast %296 : vector<8x2x32xf32> to vector<16x32xf32>
    %c0_102 = arith.constant 0 : index
    %c0_103 = arith.constant 0 : index
    %298 = vector.load %arg5[%c0_102, %c0_103] : memref<32x16xf32, #tpu.memory_space<vmem>>, vector<32x16xf32>
    %cst_104 = arith.constant dense<0.000000e+00> : vector<16x16xf32>
    %299 = tpu.matmul %297, %298, %cst_104 {dimension_numbers = #tpu.dot_dimension_numbers<[1], [0], [0], [1], [0, 0, 1, 1], [], []>} : vector<16x32xf32>, vector<32x16xf32>, vector<16x16xf32> -> vector<16x16xf32>
    %c0_105 = arith.constant 0 : index
    %c0_106 = arith.constant 0 : index
    %300 = vector.load %arg6[%c0_105, %c0_106] : memref<1x16xf32, #tpu.memory_space<vmem>>, vector<1x16xf32>
    %301 = vector.broadcast %300 : vector<1x16xf32> to vector<16x16xf32>
    %302 = arith.addf %299, %301 : vector<16x16xf32>
    %303 = vector.shape_cast %302 : vector<16x16xf32> to vector<8x2x16xf32>
    %304 = vector.extract_strided_slice %303 {offsets = [0, 0, 0], sizes = [8, 1, 16], strides = [1, 1, 1]} : vector<8x2x16xf32> to vector<8x1x16xf32>
    %305 = vector.shape_cast %304 : vector<8x1x16xf32> to vector<8x16xf32>
    %c0_107 = arith.constant 0 : index
    %c0_108 = arith.constant 0 : index
    %c0_109 = arith.constant 0 : index
    %306 = vector.load %arg9[%c0_107, %c0_108, %c0_109] : memref<2x8x16xf32, #tpu.memory_space<vmem>>, vector<1x8x16xf32>
    %307 = vector.shape_cast %306 : vector<1x8x16xf32> to vector<8x16xf32>
    %308 = vector.shape_cast %305 : vector<8x16xf32> to vector<1x8x16xf32>
    tpu.vector_store %arg9[%c0_107, %c0_108, %c0_109], %308 {strides = array<i32>} : memref<2x8x16xf32, #tpu.memory_space<vmem>>, vector<1x8x16xf32>,
    %309 = vector.extract_strided_slice %303 {offsets = [0, 1, 0], sizes = [8, 1, 16], strides = [1, 1, 1]} : vector<8x2x16xf32> to vector<8x1x16xf32>
    %310 = vector.shape_cast %309 : vector<8x1x16xf32> to vector<8x16xf32>
    %c1 = arith.constant 1 : index
    %c0_110 = arith.constant 0 : index
    %c0_111 = arith.constant 0 : index
    %311 = vector.load %arg9[%c1, %c0_110, %c0_111] : memref<2x8x16xf32, #tpu.memory_space<vmem>>, vector<1x8x16xf32>
    %312 = vector.shape_cast %311 : vector<1x8x16xf32> to vector<8x16xf32>
    %313 = vector.shape_cast %310 : vector<8x16xf32> to vector<1x8x16xf32>
    tpu.vector_store %arg9[%c1, %c0_110, %c0_111], %313 {strides = array<i32>} : memref<2x8x16xf32, #tpu.memory_space<vmem>>, vector<1x8x16xf32>,
    return
  }
  func.func @transform_0(%arg0: i32) -> (i32, i32, i32) {
    %c0_i32 = arith.constant 0 : i32
    %c0_i32_0 = arith.constant 0 : i32
    %c0_i32_1 = arith.constant 0 : i32
    return %arg0, %c0_i32, %c0_i32_0 : i32, i32, i32
  }
  func.func @transform_1(%arg0: i32) -> (i32, i32) {
    %c0_i32 = arith.constant 0 : i32
    %c0_i32_0 = arith.constant 0 : i32
    %c0_i32_1 = arith.constant 0 : i32
    return %c0_i32, %c0_i32_0 : i32, i32
  }
  func.func @transform_2(%arg0: i32) -> (i32, i32) {
    %c0_i32 = arith.constant 0 : i32
    %c0_i32_0 = arith.constant 0 : i32
    %c0_i32_1 = arith.constant 0 : i32
    return %c0_i32, %c0_i32_0 : i32, i32
  }
  func.func @transform_3(%arg0: i32) -> (i32, i32) {
    %c0_i32 = arith.constant 0 : i32
    %c0_i32_0 = arith.constant 0 : i32
    %c0_i32_1 = arith.constant 0 : i32
    return %c0_i32, %c0_i32_0 : i32, i32
  }
  func.func @transform_4(%arg0: i32) -> (i32, i32) {
    %c0_i32 = arith.constant 0 : i32
    %c0_i32_0 = arith.constant 0 : i32
    %c0_i32_1 = arith.constant 0 : i32
    return %c0_i32, %c0_i32_0 : i32, i32
  }
  func.func @transform_5(%arg0: i32) -> (i32, i32) {
    %c0_i32 = arith.constant 0 : i32
    %c0_i32_0 = arith.constant 0 : i32
    %c0_i32_1 = arith.constant 0 : i32
    return %c0_i32, %c0_i32_0 : i32, i32
  }
  func.func @transform_6(%arg0: i32) -> (i32, i32) {
    %c0_i32 = arith.constant 0 : i32
    %c0_i32_0 = arith.constant 0 : i32
    %c0_i32_1 = arith.constant 0 : i32
    return %c0_i32, %c0_i32_0 : i32, i32
  }
  func.func @transform_7(%arg0: i32) -> (i32, i32) {
    %c0_i32 = arith.constant 0 : i32
    %c0_i32_0 = arith.constant 0 : i32
    %c0_i32_1 = arith.constant 0 : i32
    return %c0_i32, %c0_i32_0 : i32, i32
  }
  func.func @transform_8(%arg0: i32) -> (i32, i32, i32) {
    %c0_i32 = arith.constant 0 : i32
    %c0_i32_0 = arith.constant 0 : i32
    %c0_i32_1 = arith.constant 0 : i32
    return %c0_i32, %arg0, %c0_i32_0 : i32, i32, i32
  }
  func.func @transform_9(%arg0: i32) -> (i32, i32) {
    %c0_i32 = arith.constant 0 : i32
    %c0_i32_0 = arith.constant 0 : i32
    %c0_i32_1 = arith.constant 0 : i32
    return %c0_i32, %c0_i32_0 : i32, i32
  }
  func.func @transform_10(%arg0: i32) -> (i32, i32) {
    %c0_i32 = arith.constant 0 : i32
    %c0_i32_0 = arith.constant 0 : i32
    %c0_i32_1 = arith.constant 0 : i32
    return %c0_i32, %c0_i32_0 : i32, i32
  }
}

</mosaic_0001>

<bundles_post_ra>
// kernel: decoder_forward.1
= control target key start
LH: loop header
LB: loop body
LE: loop exit
PB: predicated region body
PF: predicated region fallthrough
CT: control target
= control target key end

     0   :  { %16 = vsyncpa [#allocation5], 0  ;;  %v75_v2 = vlaneseq  ;;  %v1760_v6 = vmov 1983009808   ;;  %v1761_v11 = vmov 0.0   ;;  %vm39_vm0 = vcmask 254976   ;;  %s2090_s0 = inlined_call_operand.vmem [shape: f32[8,2,32], index: 0, kind: input, shape index: {}]   ;;  %s2091_s1 = inlined_call_operand.vmem [shape: f32[32,128], index: 1, kind: input, shape index: {}]   ;;  %s2092_s2 = inlined_call_operand.vmem [shape: f32[1,128], index: 2, kind: input, shape index: {}]   ;;  %s2093_s3 = inlined_call_operand.vmem [shape: f32[32,128], index: 3, kind: input, shape index: {}]   ;;  %s2094_s4 = inlined_call_operand.vmem [shape: f32[32,16], index: 4, kind: input, shape index: {}]   ;;  %s2095_s5 = inlined_call_operand.vmem [shape: f32[1,16], index: 5, kind: input, shape index: {}]   ;;  %s2096_s6 = inlined_call_operand.vmem [shape: f32[2,32], index: 6, kind: input, shape index: {}]   ;;  %s2097_s7 = inlined_call_operand.vmem [shape: f32[2,32], index: 7, kind: input, shape index: {}]   ;;  %s2098_s8 = inlined_call_operand.hbm [shape: f32[2,8,16], index: 8, kind: output, shape index: {0}]   ;;  %s2099_s9 = inlined_call_operand.hbm [shape: f32[2,32], index: 9, kind: output, shape index: {1}]   ;;  %s2100_s10 = inlined_call_operand.hbm [shape: f32[2,32], index: 10, kind: output, shape index: {2}]  }
   0x1   :  { %v54_v0 = vld [vmem:[%s2091_s1 + $0x18] sm:$0xff]  ;;  %v53_v1 = vld [vmem:[%s2091_s1 + $0x10] sm:$0xff]  ;;  %v52_v3 = vld [vmem:[%s2091_s1 + $0x8] sm:$0xff]  ;;  %v73_v7 = vunpack.c.l.s4 %v1760_v6  ;;  %1522 = vmatprep.subr.mxu1 %v1761_v11 }
   0x2   :  { %1511 = vmatprep.subr.mxu0 %v54_v0  ;;  %v43_v4 = vld [vmem:[%s2090_s0] sm:$0x3]  ;;  %v44_v5 = vld [vmem:[%s2090_s0 + $0x2] sm:$0x3]  ;;  %v45_v8 = vld [vmem:[%s2090_s0 + $0x4] sm:$0x3] }
   0x3   :  { %1512 = vmatpush3.msra.mxu0 %v54_v0  ;;  %v46_v9 = vld [vmem:[%s2090_s0 + $0x6] sm:$0x3]  ;;  %v1847_v10 = vshrl.u32 %v75_v2, 7  ;;  %v1853_v12 = vld [vmem:[%s2093_s3 + $0x18] sm:$0xff]  ;;  %v70_v13 = vcombine.low %v43_v4, %v44_v5  ;;  %v74_v15 = vunpack.c.0.s8 %v73_v7  ;;  %v47_v16 = vld [vmem:[%s2090_s0 + $0x8] sm:$0x3] }
   0x4   :  { %1513 = vmatprep.subr.mxu0 %v53_v1  ;;  %v71_v14 = vcombine.low %v45_v8, %v46_v9  ;;  %v48_v17 = vld [vmem:[%s2090_s0 + $0xa] sm:$0x3]  ;;  %v49_v18 = vld [vmem:[%s2090_s0 + $0xc] sm:$0x3]  ;;  %1523 = vmatpush3.msra.mxu1 %v1853_v12  ;;  %v51_v19 = vld [vmem:[%s2091_s1] sm:$0xff] }
   0x5   :  { %1514 = vmatpush3.msra.mxu0 %v53_v1  ;;  %v50_v20 = vld [vmem:[%s2090_s0 + $0xe] sm:$0x3]  ;;  %v87_v21 = vcombine.low %v47_v16, %v48_v17  ;;  %1524 = vmatprep.subr.mxu1 %v1761_v11  ;;  %v1875_v22 = vld [vmem:[%s2093_s3 + $0x10] sm:$0xff]  ;;  %v1878_v23 = vsub.s32 %v74_v15, %v1847_v10  ;;  %v38_v26 = vld [vmem:[%s2096_s6] sm:$0x3] }
   0x6   :  { %1515 = vmatprep.subr.mxu0 %v52_v3  ;;  %v88_v24 = vcombine.low %v49_v18, %v50_v20  ;;  %1525 = vmatpush3.msra.mxu1 %v1875_v22  ;;  %v1884_v25 = vld [vmem:[%s2093_s3 + $0x8] sm:$0xff] }
   0x7   :  { %17 = vsyncpa [#allocation7], 0  ;;  %1516 = vmatpush3.msra.mxu0 %v52_v3  ;;  %1526 = vmatprep.subr.mxu1 %v1761_v11  ;;  %40 = vst.msk [vmem:[#allocation6] sm:$0x3] %vm39_vm0, %v38_v26  ;;  %v78_v27 = vrot.slane %v70_v13, %v1878_v23  ;;  %v85_v28 = vrot.slane %v71_v14, %v1878_v23  ;;  %v1898_v31 = vld [vmem:[%s2093_s3] sm:$0xff]  ;;  %vm104_vm1 = vcmask 261120  }
   0x8   :  { %1517 = vmatprep.subr.mxu0 %v51_v19  ;;  %v95_v29 = vrot.slane %v87_v21, %v1878_v23  ;;  %v102_v30 = vrot.slane %v88_v24, %v1878_v23  ;;  %1527 = vmatpush3.msra.mxu1 %v1884_v25  ;;  %vm1762_vm2 = vmmov 0   ;;  %v41_v35 = vld [vmem:[%s2097_s7] sm:$0x3]  ;;  %s1764_s7 = smov 32   ;;  %s1765_s27 = smov 96  }
   0x9   :  { %1518 = vmatpush3.msra.mxu0 %v51_v19  ;;  %v86_v32 = vcombine.low %v78_v27, %v85_v28  ;;  %1528 = vmatprep.subr.mxu1 %v1761_v11  ;;  %42 = vst.msk [vmem:[#allocation8] sm:$0x3] %vm39_vm0, %v41_v35  ;;  %v1433_v36 = vld [vmem:[%s2092_s2] ss:$0 sm:$0xff]  ;;  %s1763_s2 = smov 64  }
   0xa   :  { %v103_v33 = vcombine.low %v95_v29, %v102_v30  ;;  %1530 = vmatprep.mubr.msk.f32.mxu1 %vm1762_vm2, %v1761_v11  ;;  %1529 = vmatpush3.msra.mxu1 %v1898_v31 }
   0xb   :  { %1533 = vmatprep.subr.mxu0 %v1761_v11  ;;  %1519 = vmatprep.mubr.msk.f32.mxu0 %vm104_vm1, %v86_v32 }
   0xc   :  { %1544 = vmatprep.subr.mxu1 %v1761_v11  ;;  %1520 = vmatmul.mubr.msk.f32.vlgmr.msra.gmra.mxu0 %vm104_vm1, %v103_v33 }
   0xd   :  { %1534 = vmatpush3.msra.mxu0 %v1853_v12  ;;  %1541 = vmatprep.mubr.msk.f32.mxu0 %vm1762_vm2, %v1761_v11 }
   0xe   :  { %v236_v34 = vld [vmem:[#allocation6] sm:$0x3]  ;;  %1535 = vmatprep.subr.mxu0 %v1761_v11 }
   0xf   :  { %1531 = vmatmul.mubr.msk.f32.vlgmr.msra.gmra.mxu1 %vm104_vm1, %v236_v34  ;;  %1536 = vmatpush3.msra.mxu0 %v1875_v22 }
  0x10   :  { %1545 = vmatpush3.msra.mxu1 %v1853_v12  ;;  %1537 = vmatprep.subr.mxu0 %v1761_v11  ;;  %v237_v56 = vld [vmem:[#allocation8] sm:$0x3] }
  0x11   :  { %1546 = vmatprep.subr.mxu1 %v1761_v11  ;;  %1538 = vmatpush3.msra.mxu0 %v1884_v25 }
  0x12   :  { %1547 = vmatpush3.msra.mxu1 %v1875_v22  ;;  %1539 = vmatprep.subr.mxu0 %v1761_v11 }
  0x13   :  { %1548 = vmatprep.subr.mxu1 %v1761_v11  ;;  %1540 = vmatpush3.msra.mxu0 %v1898_v31 }
  0x14   :  { %1549 = vmatpush3.msra.mxu1 %v1884_v25  ;;  %1552 = vmatprep.mubr.msk.f32.mxu1 %vm1762_vm2, %v1761_v11 }
  0x15   :  { %1550 = vmatprep.subr.mxu1 %v1761_v11  ;;  %1555 = vmatprep.subr.mxu0 %v1761_v11 }
  0x16   :  { %1551 = vmatpush3.msra.mxu1 %v1898_v31 }
  0x17   :  { %1566 = vmatprep.subr.mxu1 %v1761_v11 }
  0xcc   :  { %v1521_v37 = vpop.f32.mrf.mxu0 }
  0xcd   :  { %v181_v38 = vadd.f32 %v1521_v37, %v1433_v36 }
  0xce   :  { %v175_v39 = vpop.f32.mrf.mxu0 }
  0xcf   :  { %v312_v40 = vpop.f32.mrf.mxu1  ;;  %v203_v41 = vcombine.high %v181_v38, %v181_v38  ;;  %v210_v42 = vrot.slane %v181_v38, %v1878_v23  ;;  %1438 = vst.sshfl [vmem:[#allocation2 + $0x8] sm:$0x3 pattern:$0x76325410] %v181_v38  ;;  %v176_v43 = vadd.f32 %v1433_v36, %v175_v39 }
  0xd1   :  { %v1532_v44 = vpop.f32.mrf.mxu1  ;;  %v217_v45 = vrot.slane %v203_v41, %v1878_v23  ;;  %v218_v46 = vcombine.high %v210_v42, %v210_v42  ;;  %1439 = vst.sshfl [vmem:[#allocation2 + $0xc] sm:$0x3 pattern:$0x76325410] %v203_v41  ;;  %v186_v47 = vcombine.high %v176_v43, %v176_v43  ;;  %v193_v48 = vrot.slane %v176_v43, %v1878_v23 }
  0xd2   :  { %1436 = vst.sshfl [vmem:[#allocation2] sm:$0x3 pattern:$0x76325410] %v176_v43 }
  0xd3   :  { %v219_v49 = vcombine.high %v217_v45, %v217_v45  ;;  %233 = vst [vmem:[#allocation2 + $0xa] sm:$0x3] %v218_v46  ;;  %v200_v50 = vrot.slane %v186_v47, %v1878_v23  ;;  %v201_v51 = vcombine.high %v193_v48, %v193_v48  ;;  %1437 = vst.sshfl [vmem:[#allocation2 + $0x4] sm:$0x3 pattern:$0x76325410] %v186_v47 }
  0xd5   :  { %235 = vst [vmem:[#allocation2 + $0xe] sm:$0x3] %v219_v49  ;;  %v202_v52 = vcombine.high %v200_v50, %v200_v50  ;;  %229 = vst [vmem:[#allocation2 + $0x2] sm:$0x3] %v201_v51 }
  0xd7   :  { %231 = vst [vmem:[#allocation2 + $0x6] sm:$0x3] %v202_v52 }
  0xd9   :  { %v238_v53 = vld [vmem:[#allocation2] sm:$0x3] }
  0xda   :  { %v316_v54 = vadd.f32 %v312_v40, %v238_v53  ;;  %v461_v32 = vld [vmem:[#allocation2 + $0x4] sm:$0x3] }
  0xdc   :  { %1632 = vtanh.f32 %v316_v54  ;;  %v1441_v57 = vmul.f32 -1.442695, %v316_v54  ;;  %v352_v7 = vld [vmem:[#allocation2 + $0x2] sm:$0x3] }
  0xde   :  { %1634 = vpow2.f32 %v1441_v57  ;;  %v570_v50 = vld [vmem:[#allocation2 + $0x6] sm:$0x3] }
  0xe9   :  { %v1633_v55 = vpop.eup %1632 }
  0xea   :  { %330 = vrot.lane.b32.xlu0 %v1633_v55, %s1763_s2 }
  0xeb   :  { %v1635_v58 = vpop.eup %1634 }
  0xec   :  { %v320_v59 = vadd.f32 1.0, %v1635_v58 }
  0xee   :  { %325 = vrot.lane.b32.xlu0 %v237_v56, %s1764_s7  ;;  %1636 = vrcp.f32 %v320_v59 }
  0xfb   :  { %v1637_v60 = vpop.eup %1636 }
 0x15c   :  { %v331_v61 = vpop.permute.xlu0 %330 }
 0x15d   :  { %v333_v62 = vmul.f32 %v1637_v60, %v331_v61 }
 0x15f   :  { %335 = vrot.lane.b32.xlu1 %v333_v62, %s1764_s7 }
 0x160   :  { %v326_v63 = vpop.permute.xlu0 %325 }
 0x161   :  { %v328_v0 = vmul.f32 %v1637_v60, %v326_v63 }
 0x1d1   :  { %v336_v1 = vpop.permute.xlu1 %335 }
 0x1d2   :  { %v338_v2 = vadd.f32 %v336_v1, %v328_v0 }
 0x1d4   :  { %1638 = vtanh.f32 %v338_v2 }
 0x1e1   :  { %v1639_v3 = vpop.eup %1638 }
 0x1e2   :  { %341 = vrot.lane.b32.xlu1 %v1639_v3, %s1763_s2 }
 0x254   :  { %v342_v4 = vpop.permute.xlu1 %341 }
 0x255   :  { %v344_v5 = vmul.f32 %v1637_v60, %v342_v4  ;;  %v679_v4 = vld [vmem:[#allocation2 + $0x8] sm:$0x3] }
 0x257   :  { %346 = vrot.lane.b32.xlu0 %v344_v5, %s1764_s7 }
 0x2c9   :  { %v347_v6 = vpop.permute.xlu0 %346 }
 0x2ca   :  { %350 = vst.msk [vmem:[#allocation3] sm:$0x3] %vm39_vm0, %v347_v6  ;;  %1542 = vmatmul.mubr.msk.f32.vlgmr.msra.gmra.mxu0 %vm104_vm1, %v347_v6 }
 0x2cb   :  { %1556 = vmatpush3.msra.mxu0 %v1853_v12  ;;  %1563 = vmatprep.mubr.msk.f32.mxu0 %vm1762_vm2, %v1761_v11 }
 0x2cc   :  { %1557 = vmatprep.subr.mxu0 %v1761_v11 }
 0x2cd   :  { %1558 = vmatpush3.msra.mxu0 %v1875_v22 }
 0x2ce   :  { %1559 = vmatprep.subr.mxu0 %v1761_v11 }
 0x2cf   :  { %1560 = vmatpush3.msra.mxu0 %v1884_v25 }
 0x2d0   :  { %1561 = vmatprep.subr.mxu0 %v1761_v11 }
 0x2d1   :  { %1562 = vmatpush3.msra.mxu0 %v1898_v31 }
 0x2d2   :  { %1577 = vmatprep.subr.mxu0 %v1761_v11 }
 0x38a   :  { %v425_v8 = vpop.f32.mrf.mxu0 }
 0x38b   :  { %v429_v9 = vadd.f32 %v425_v8, %v352_v7 }
 0x38c   :  { %v1543_v13 = vpop.f32.mrf.mxu0 }
 0x38d   :  { %1640 = vtanh.f32 %v429_v9  ;;  %v1443_v15 = vmul.f32 -1.442695, %v429_v9 }
 0x38f   :  { %1642 = vpow2.f32 %v1443_v15 }
 0x39a   :  { %v1641_v14 = vpop.eup %1640 }
 0x39b   :  { %439 = vrot.lane.b32.xlu1 %v1641_v14, %s1763_s2 }
 0x39c   :  { %v1643_v16 = vpop.eup %1642 }
 0x39d   :  { %v433_v17 = vadd.f32 1.0, %v1643_v16 }
 0x39f   :  { %1644 = vrcp.f32 %v433_v17 }
 0x3ac   :  { %v1645_v18 = vpop.eup %1644 }
 0x3ad   :  { %v437_v21 = vmul.f32 %v1645_v18, %v338_v2 }
 0x40d   :  { %v440_v19 = vpop.permute.xlu1 %439 }
 0x40e   :  { %v442_v20 = vmul.f32 %v1645_v18, %v440_v19 }
 0x410   :  { %444 = vrot.lane.b32.xlu0 %v442_v20, %s1764_s7 }
 0x482   :  { %v445_v24 = vpop.permute.xlu0 %444 }
 0x483   :  { %v447_v26 = vadd.f32 %v445_v24, %v437_v21 }
 0x485   :  { %1646 = vtanh.f32 %v447_v26 }
 0x492   :  { %v1647_v27 = vpop.eup %1646 }
 0x493   :  { %450 = vrot.lane.b32.xlu1 %v1647_v27, %s1763_s2 }
 0x505   :  { %v451_v28 = vpop.permute.xlu1 %450 }
 0x506   :  { %v453_v29 = vmul.f32 %v1645_v18, %v451_v28  ;;  %v788_v28 = vld [vmem:[#allocation2 + $0xa] sm:$0x3] }
 0x508   :  { %455 = vrot.lane.b32.xlu0 %v453_v29, %s1764_s7 }
 0x57a   :  { %v456_v30 = vpop.permute.xlu0 %455 }
 0x57b   :  { %459 = vst.msk [vmem:[#allocation3 + $0x2] sm:$0x3] %vm39_vm0, %v456_v30  ;;  %1553 = vmatmul.mubr.msk.f32.vlgmr.msra.gmra.mxu1 %vm104_vm1, %v456_v30 }
 0x57c   :  { %1567 = vmatpush3.msra.mxu1 %v1853_v12  ;;  %1574 = vmatprep.mubr.msk.f32.mxu1 %vm1762_vm2, %v1761_v11 }
 0x57d   :  { %1568 = vmatprep.subr.mxu1 %v1761_v11 }
 0x57e   :  { %1569 = vmatpush3.msra.mxu1 %v1875_v22 }
 0x57f   :  { %1570 = vmatprep.subr.mxu1 %v1761_v11 }
 0x580   :  { %1571 = vmatpush3.msra.mxu1 %v1884_v25 }
 0x581   :  { %1572 = vmatprep.subr.mxu1 %v1761_v11 }
 0x582   :  { %1573 = vmatpush3.msra.mxu1 %v1898_v31 }
 0x583   :  { %1588 = vmatprep.subr.mxu1 %v1761_v11 }
 0x63b   :  { %v534_v33 = vpop.f32.mrf.mxu1 }
 0x63c   :  { %v538_v34 = vadd.f32 %v534_v33, %v461_v32 }
 0x63d   :  { %v1554_v35 = vpop.f32.mrf.mxu1 }
 0x63e   :  { %1648 = vtanh.f32 %v538_v34  ;;  %v1445_v37 = vmul.f32 -1.442695, %v538_v34 }
 0x640   :  { %1650 = vpow2.f32 %v1445_v37 }
 0x64b   :  { %v1649_v36 = vpop.eup %1648 }
 0x64c   :  { %548 = vrot.lane.b32.xlu1 %v1649_v36, %s1763_s2 }
 0x64d   :  { %v1651_v38 = vpop.eup %1650 }
 0x64e   :  { %v542_v39 = vadd.f32 1.0, %v1651_v38 }
 0x650   :  { %1652 = vrcp.f32 %v542_v39 }
 0x65d   :  { %v1653_v40 = vpop.eup %1652 }
 0x65e   :  { %v546_v43 = vmul.f32 %v1653_v40, %v447_v26 }
 0x6be   :  { %v549_v41 = vpop.permute.xlu1 %548 }
 0x6bf   :  { %v551_v42 = vmul.f32 %v1653_v40, %v549_v41 }
 0x6c1   :  { %553 = vrot.lane.b32.xlu0 %v551_v42, %s1764_s7  ;;  %v1121_v42 = vld [vmem:[#allocation3 + $0x2] sm:$0x3] }
 0x733   :  { %v554_v44 = vpop.permute.xlu0 %553 }
 0x734   :  { %v556_v45 = vadd.f32 %v554_v44, %v546_v43 }
 0x736   :  { %1654 = vtanh.f32 %v556_v45 }
 0x743   :  { %v1655_v46 = vpop.eup %1654 }
 0x744   :  { %559 = vrot.lane.b32.xlu1 %v1655_v46, %s1763_s2 }
 0x7b6   :  { %v560_v47 = vpop.permute.xlu1 %559 }
 0x7b7   :  { %v562_v48 = vmul.f32 %v1653_v40, %v560_v47 }
 0x7b9   :  { %564 = vrot.lane.b32.xlu0 %v562_v48, %s1764_s7 }
 0x82b   :  { %v565_v49 = vpop.permute.xlu0 %564 }
 0x82c   :  { %568 = vst.msk [vmem:[#allocation3 + $0x4] sm:$0x3] %vm39_vm0, %v565_v49  ;;  %1564 = vmatmul.mubr.msk.f32.vlgmr.msra.gmra.mxu0 %vm104_vm1, %v565_v49 }
 0x82d   :  { %1578 = vmatpush3.msra.mxu0 %v1853_v12  ;;  %1585 = vmatprep.mubr.msk.f32.mxu0 %vm1762_vm2, %v1761_v11 }
 0x82e   :  { %1579 = vmatprep.subr.mxu0 %v1761_v11 }
 0x82f   :  { %1580 = vmatpush3.msra.mxu0 %v1875_v22 }
 0x830   :  { %1581 = vmatprep.subr.mxu0 %v1761_v11 }
 0x831   :  { %1582 = vmatpush3.msra.mxu0 %v1884_v25 }
 0x832   :  { %1583 = vmatprep.subr.mxu0 %v1761_v11 }
 0x833   :  { %1584 = vmatpush3.msra.mxu0 %v1898_v31  ;;  %v1122_v43 = vld [vmem:[#allocation3 + $0x4] sm:$0x3] }
 0x834   :  { %1599 = vmatprep.subr.mxu0 %v1761_v11 }
 0x8ec   :  { %v643_v51 = vpop.f32.mrf.mxu0 }
 0x8ed   :  { %v647_v52 = vadd.f32 %v643_v51, %v570_v50  ;;  %v897_v51 = vld [vmem:[#allocation2 + $0xc] sm:$0x3] }
 0x8ee   :  { %v1565_v53 = vpop.f32.mrf.mxu0 }
 0x8ef   :  { %1656 = vtanh.f32 %v647_v52  ;;  %v1447_v55 = vmul.f32 -1.442695, %v647_v52 }
 0x8f1   :  { %1658 = vpow2.f32 %v1447_v55 }
 0x8fc   :  { %v1657_v54 = vpop.eup %1656 }
 0x8fd   :  { %657 = vrot.lane.b32.xlu1 %v1657_v54, %s1763_s2 }
 0x8fe   :  { %v1659_v56 = vpop.eup %1658 }
 0x8ff   :  { %v651_v57 = vadd.f32 1.0, %v1659_v56 }
 0x901   :  { %1660 = vrcp.f32 %v651_v57 }
 0x90e   :  { %v1661_v58 = vpop.eup %1660 }
 0x90f   :  { %v655_v61 = vmul.f32 %v1661_v58, %v556_v45  ;;  %v1120_v45 = vld [vmem:[#allocation3] sm:$0x3] }
 0x910   :  { %v1147_v46 = vcombine.low %v1120_v45, %v1121_v42 }
 0x912   :  { %v1155_v48 = vrot.slane %v1147_v46, %v1878_v23 }
 0x96f   :  { %v658_v59 = vpop.permute.xlu1 %657 }
 0x970   :  { %v660_v60 = vmul.f32 %v1661_v58, %v658_v59 }
 0x972   :  { %662 = vrot.lane.b32.xlu0 %v660_v60, %s1764_s7 }
 0x9e4   :  { %v663_v62 = vpop.permute.xlu0 %662 }
 0x9e5   :  { %v665_v63 = vadd.f32 %v663_v62, %v655_v61 }
 0x9e7   :  { %1662 = vtanh.f32 %v665_v63 }
 0x9f4   :  { %v1663_v0 = vpop.eup %1662 }
 0x9f5   :  { %668 = vrot.lane.b32.xlu1 %v1663_v0, %s1763_s2 }
 0xa67   :  { %v669_v1 = vpop.permute.xlu1 %668 }
 0xa68   :  { %v671_v2 = vmul.f32 %v1661_v58, %v669_v1 }
 0xa6a   :  { %673 = vrot.lane.b32.xlu0 %v671_v2, %s1764_s7 }
 0xadc   :  { %v674_v3 = vpop.permute.xlu0 %673 }
 0xadd   :  { %677 = vst.msk [vmem:[#allocation3 + $0x6] sm:$0x3] %vm39_vm0, %v674_v3  ;;  %1575 = vmatmul.mubr.msk.f32.vlgmr.msra.gmra.mxu1 %vm104_vm1, %v674_v3 }
 0xade   :  { %1589 = vmatpush3.msra.mxu1 %v1853_v12  ;;  %1596 = vmatprep.mubr.msk.f32.mxu1 %vm1762_vm2, %v1761_v11 }
 0xadf   :  { %1590 = vmatprep.subr.mxu1 %v1761_v11 }
 0xae0   :  { %1591 = vmatpush3.msra.mxu1 %v1875_v22 }
 0xae1   :  { %1592 = vmatprep.subr.mxu1 %v1761_v11 }
 0xae2   :  { %1593 = vmatpush3.msra.mxu1 %v1884_v25 }
 0xae3   :  { %1594 = vmatprep.subr.mxu1 %v1761_v11 }
 0xae4   :  { %1595 = vmatpush3.msra.mxu1 %v1898_v31  ;;  %v1123_v41 = vld [vmem:[#allocation3 + $0x6] sm:$0x3] }
 0xae5   :  { %v1148_v44 = vcombine.low %v1122_v43, %v1123_v41 }
 0xae7   :  { %v1162_v47 = vrot.slane %v1148_v44, %v1878_v23 }
 0xae9   :  { %v1163_v50 = vcombine.low %v1155_v48, %v1162_v47 }
 0xb9d   :  { %v752_v5 = vpop.f32.mrf.mxu1 }
 0xb9e   :  { %v756_v6 = vadd.f32 %v752_v5, %v679_v4  ;;  %v1006_v5 = vld [vmem:[#allocation2 + $0xe] sm:$0x3] }
 0xb9f   :  { %v1576_v7 = vpop.f32.mrf.mxu1 }
 0xba0   :  { %1664 = vtanh.f32 %v756_v6  ;;  %v1449_v9 = vmul.f32 -1.442695, %v756_v6 }
 0xba2   :  { %1666 = vpow2.f32 %v1449_v9 }
 0xbad   :  { %v1665_v8 = vpop.eup %1664 }
 0xbae   :  { %766 = vrot.lane.b32.xlu1 %v1665_v8, %s1763_s2 }
 0xbaf   :  { %v1667_v13 = vpop.eup %1666 }
 0xbb0   :  { %v760_v14 = vadd.f32 1.0, %v1667_v13 }
 0xbb2   :  { %1668 = vrcp.f32 %v760_v14 }
 0xbbf   :  { %v1669_v15 = vpop.eup %1668 }
 0xbc0   :  { %v764_v18 = vmul.f32 %v1669_v15, %v665_v63 }
 0xc20   :  { %v767_v16 = vpop.permute.xlu1 %766 }
 0xc21   :  { %v769_v17 = vmul.f32 %v1669_v15, %v767_v16 }
 0xc23   :  { %771 = vrot.lane.b32.xlu0 %v769_v17, %s1764_s7 }
 0xc95   :  { %v772_v19 = vpop.permute.xlu0 %771 }
 0xc96   :  { %v774_v20 = vadd.f32 %v772_v19, %v764_v18 }
 0xc98   :  { %1670 = vtanh.f32 %v774_v20 }
 0xca5   :  { %v1671_v21 = vpop.eup %1670 }
 0xca6   :  { %777 = vrot.lane.b32.xlu1 %v1671_v21, %s1763_s2 }
 0xd18   :  { %v778_v24 = vpop.permute.xlu1 %777 }
 0xd19   :  { %v780_v26 = vmul.f32 %v1669_v15, %v778_v24 }
 0xd1b   :  { %782 = vrot.lane.b32.xlu0 %v780_v26, %s1764_s7  ;;  %v1131_v26 = vld [vmem:[%s2094_s4 + $0x18] sm:$0xff] }
 0xd1c   :  { %1610 = vmatprep.subr.mxu1 %v1131_v26 }
 0xd8d   :  { %v783_v27 = vpop.permute.xlu0 %782 }
 0xd8e   :  { %786 = vst.msk [vmem:[#allocation3 + $0x8] sm:$0x3] %vm39_vm0, %v783_v27  ;;  %1586 = vmatmul.mubr.msk.f32.vlgmr.msra.gmra.mxu0 %vm104_vm1, %v783_v27  ;;  %v1130_v27 = vld [vmem:[%s2094_s4 + $0x10] sm:$0xff] }
 0xd8f   :  { %1600 = vmatpush3.msra.mxu0 %v1853_v12  ;;  %1607 = vmatprep.mubr.msk.f32.mxu0 %vm1762_vm2, %v1761_v11 }
 0xd90   :  { %1601 = vmatprep.subr.mxu0 %v1761_v11 }
 0xd91   :  { %1602 = vmatpush3.msra.mxu0 %v1875_v22 }
 0xd92   :  { %1603 = vmatprep.subr.mxu0 %v1761_v11 }
 0xd93   :  { %1604 = vmatpush3.msra.mxu0 %v1884_v25 }
 0xd94   :  { %1605 = vmatprep.subr.mxu0 %v1761_v11 }
 0xd95   :  { %1606 = vmatpush3.msra.mxu0 %v1898_v31 }
 0xe4e   :  { %v861_v29 = vpop.f32.mrf.mxu0 }
 0xe4f   :  { %v865_v30 = vadd.f32 %v861_v29, %v788_v28  ;;  %v1129_v28 = vld [vmem:[%s2094_s4 + $0x8] sm:$0xff]  ;;  %v1128_v29 = vld [vmem:[%s2094_s4] sm:$0xff]  ;;  %s1766_s4 = smov [#allocation6]  }
 0xe50   :  { %v1587_v32 = vpop.f32.mrf.mxu0  ;;  %s1408_s16 = sshll.u32 %s1766_s4, 4  ;;  %s1409_s16 = int_to_ptr.vmem [resolvable:$true] %s1408_s16 }
 0xe51   :  { %1672 = vtanh.f32 %v865_v30  ;;  %v1451_v33 = vmul.f32 -1.442695, %v865_v30  ;;  %s1696_s17 = scalar_lea.vmem %s1409_s16, 32  ;;  %p1701_p1 = scmp.lt.s32.totalorder %s1409_s16, %s1409_s16 }
 0xe52   :  { %p1697_p0 = scmp.ne.s32.totalorder %s1409_s16, %s1696_s17  ;;  %p1702_p2 = scmp.lt.s32.totalorder %s1696_s17, %s1696_s17 }
 0xe53   :  { %1674 = vpow2.f32 %v1451_v33 }
 0xe54   :  { %p1703_p3 = por %p1702_p2, %p1701_p1 }
 0xe56   :  { %p1704_p4 = pnand %p1703_p3, %p1697_p0 }
 0xe5e   :  { %v1673_v12 = vpop.eup %1672 }
 0xe5f   :  { %875 = vrot.lane.b32.xlu1 %v1673_v12, %s1763_s2 }
 0xe60   :  { %v1675_v34 = vpop.eup %1674 }
 0xe61   :  { %v869_v22 = vadd.f32 1.0, %v1675_v34 }
 0xe63   :  { %1676 = vrcp.f32 %v869_v22  ;;  %v1124_v22 = vld [vmem:[#allocation3 + $0x8] sm:$0x3] }
 0xe70   :  { %v1677_v35 = vpop.eup %1676 }
 0xe71   :  { %v873_v11 = vmul.f32 %v1677_v35, %v774_v20 }
 0xed1   :  { %v876_v36 = vpop.permute.xlu1 %875 }
 0xed2   :  { %v878_v25 = vmul.f32 %v1677_v35, %v876_v36 }
 0xed4   :  { %880 = vrot.lane.b32.xlu0 %v878_v25, %s1764_s7 }
 0xf46   :  { %v881_v31 = vpop.permute.xlu0 %880 }
 0xf47   :  { %v883_v37 = vadd.f32 %v881_v31, %v873_v11 }
 0xf49   :  { %1678 = vtanh.f32 %v883_v37 }
 0xf56   :  { %v1679_v38 = vpop.eup %1678 }
 0xf57   :  { %886 = vrot.lane.b32.xlu1 %v1679_v38, %s1763_s2 }
 0xfc9   :  { %v887_v39 = vpop.permute.xlu1 %886 }
 0xfca   :  { %v889_v40 = vmul.f32 %v1677_v35, %v887_v39 }
 0xfcc   :  { %891 = vrot.lane.b32.xlu0 %v889_v40, %s1764_s7 }
0x103e   :  { %v892_v49 = vpop.permute.xlu0 %891 }
0x103f   :  { %895 = vst.msk [vmem:[#allocation3 + $0xa] sm:$0x3] %vm39_vm0, %v892_v49  ;;  %1597 = vmatmul.mubr.msk.f32.vlgmr.msra.gmra.mxu1 %vm104_vm1, %v892_v49 }
0x1040   :  { %1618 = vmatprep.mubr.msk.f32.mxu1 %vm104_vm1, %v1163_v50  ;;  %1611 = vmatpush3.msra.mxu1 %v1131_v26 }
0x1041   :  { %1612 = vmatprep.subr.mxu1 %v1130_v27 }
0x1042   :  { %1613 = vmatpush3.msra.mxu1 %v1130_v27 }
0x1043   :  { %1614 = vmatprep.subr.mxu1 %v1129_v28 }
0x1044   :  { %1615 = vmatpush3.msra.mxu1 %v1129_v28 }
0x1045   :  { %1616 = vmatprep.subr.mxu1 %v1128_v29 }
0x1046   :  { %1617 = vmatpush3.msra.mxu1 %v1128_v29  ;;  %v1125_v34 = vld [vmem:[#allocation3 + $0xa] sm:$0x3] }
0x1047   :  { %v1164_v35 = vcombine.low %v1124_v22, %v1125_v34 }
0x1049   :  { %v1172_v31 = vrot.slane %v1164_v35, %v1878_v23 }
0x10ff   :  { %v970_v52 = vpop.f32.mrf.mxu1 }
0x1100   :  { %v974_v53 = vadd.f32 %v970_v52, %v897_v51 }
0x1101   :  { %v1598_v54 = vpop.f32.mrf.mxu1 }
0x1102   :  { %1680 = vtanh.f32 %v974_v53  ;;  %v1453_v56 = vmul.f32 -1.442695, %v974_v53 }
0x1104   :  { %1682 = vpow2.f32 %v1453_v56 }
0x110f   :  { %v1681_v55 = vpop.eup %1680 }
0x1110   :  { %984 = vrot.lane.b32.xlu1 %v1681_v55, %s1763_s2 }
0x1111   :  { %v1683_v57 = vpop.eup %1682 }
0x1112   :  { %v978_v58 = vadd.f32 1.0, %v1683_v57 }
0x1114   :  { %1684 = vrcp.f32 %v978_v58 }
0x1121   :  { %v1685_v59 = vpop.eup %1684 }
0x1122   :  { %v982_v62 = vmul.f32 %v1685_v59, %v883_v37 }
0x1182   :  { %v985_v60 = vpop.permute.xlu1 %984 }
0x1183   :  { %v987_v61 = vmul.f32 %v1685_v59, %v985_v60 }
0x1185   :  { %989 = vrot.lane.b32.xlu0 %v987_v61, %s1764_s7 }
0x11f7   :  { %v990_v63 = vpop.permute.xlu0 %989 }
0x11f8   :  { %v992_v0 = vadd.f32 %v990_v63, %v982_v62 }
0x11fa   :  { %1686 = vtanh.f32 %v992_v0 }
0x1207   :  { %v1687_v1 = vpop.eup %1686 }
0x1208   :  { %995 = vrot.lane.b32.xlu1 %v1687_v1, %s1763_s2 }
0x127a   :  { %v996_v2 = vpop.permute.xlu1 %995 }
0x127b   :  { %v998_v3 = vmul.f32 %v1685_v59, %v996_v2 }
0x127d   :  { %1000 = vrot.lane.b32.xlu0 %v998_v3, %s1764_s7 }
0x12ef   :  { %v1001_v4 = vpop.permute.xlu0 %1000 }
0x12f0   :  { %1004 = vst.msk [vmem:[#allocation3 + $0xc] sm:$0x3] %vm39_vm0, %v1001_v4  ;;  %1608 = vmatmul.mubr.msk.f32.vlgmr.msra.gmra.mxu0 %vm104_vm1, %v1001_v4 }
0x12f7   :  { %v1126_v36 = vld [vmem:[#allocation3 + $0xc] sm:$0x3] }
0x13b0   :  { %v1079_v6 = vpop.f32.mrf.mxu0 }
0x13b1   :  { %v1083_v7 = vadd.f32 %v1079_v6, %v1006_v5 }
0x13b2   :  { %v1609_v8 = vpop.f32.mrf.mxu0 }
0x13b3   :  { %1688 = vtanh.f32 %v1083_v7  ;;  %v1455_v13 = vmul.f32 -1.442695, %v1083_v7 }
0x13b5   :  { %1690 = vpow2.f32 %v1455_v13 }
0x13c0   :  { %v1689_v9 = vpop.eup %1688 }
0x13c1   :  { %1093 = vrot.lane.b32.xlu1 %v1689_v9, %s1763_s2 }
0x13c2   :  { %v1691_v14 = vpop.eup %1690 }
0x13c3   :  { %v1087_v15 = vadd.f32 1.0, %v1691_v14 }
0x13c5   :  { %1692 = vrcp.f32 %v1087_v15 }
0x13d2   :  { %v1693_v16 = vpop.eup %1692 }
0x13d3   :  { %v1091_v19 = vmul.f32 %v1693_v16, %v992_v0 }
0x1433   :  { %v1094_v17 = vpop.permute.xlu1 %1093 }
0x1434   :  { %v1096_v18 = vmul.f32 %v1693_v16, %v1094_v17 }
0x1436   :  { %1098 = vrot.lane.b32.xlu0 %v1096_v18, %s1764_s7 }
0x14a8   :  { %v1099_v20 = vpop.permute.xlu0 %1098 }
0x14a9   :  { %v1101_v21 = vadd.f32 %v1099_v20, %v1091_v19 }
0x14ab   :  { %1694 = vtanh.f32 %v1101_v21 }
0x14b8   :  { %v1695_v24 = vpop.eup %1694 }
0x14b9   :  { %1104 = vrot.lane.b32.xlu1 %v1695_v24, %s1763_s2 }
0x14bd   :  { %1116 = vrot.lane.b32.xlu1 %v1101_v21, %s1765_s27 }
0x152b   :  { %v1105_v30 = vpop.permute.xlu1 %1104 }
0x152c   :  { %v1107_v32 = vmul.f32 %v1693_v16, %v1105_v30 }
0x152e   :  { %1109 = vrot.lane.b32.xlu0 %v1107_v32, %s1764_s7 }
0x152f   :  { %v1117_v12 = vpop.permute.xlu1 %1116 }
0x1530   :  { %1119 = vst.msk [vmem:[#allocation8] sm:$0x3] %vm39_vm0, %v1117_v12 }
0x15a0   :  { %v1110_v33 = vpop.permute.xlu0 %1109 }
0x15a1   :  { %1113 = vst.msk [vmem:[#allocation3 + $0xe] sm:$0x3] %vm39_vm0, %v1110_v33  ;;  %1114 = vst.msk [vmem:[#allocation6] sm:$0x3] %vm39_vm0, %v1110_v33 }
0x15a8   :  { %v1127_v25 = vld [vmem:[#allocation3 + $0xe] sm:$0x3] }
0x15a9   :  { %v1165_v11 = vcombine.low %v1126_v36, %v1127_v25 }
0x15ab   :  { %v1179_v37 = vrot.slane %v1165_v11, %v1878_v23 }
0x15ad   :  { %v1180_v38 = vcombine.low %v1172_v31, %v1179_v37 }
0x15af   :  { %1619 = vmatmul.mubr.msk.f32.vlgmr.msra.gmra.mxu1 %vm104_vm1, %v1180_v38 }
0x15b0   :  { %1707 = shalt.err (!%p1704_p4)
}
0x15b1   :  { %1411 = dma.vmem_to_hbm [thread:$0]  %s1409_s16, 32, %s2099_s9, [#allocation7]  }
0x15b2   :  { %s1767_s20 = smov [#allocation8]  }
0x15b3   :  { %s1418_s1 = sshll.u32 %s1767_s20, 4  ;;  %s1419_s1 = int_to_ptr.vmem [resolvable:$true] %s1418_s1 }
0x15b4   :  { %s1716_s21 = scalar_lea.vmem %s1419_s1, 32  ;;  %p1721_p6 = scmp.lt.s32.totalorder %s1419_s1, %s1419_s1 }
0x15b5   :  { %p1717_p5 = scmp.ne.s32.totalorder %s1419_s1, %s1716_s21  ;;  %p1722_p7 = scmp.lt.s32.totalorder %s1716_s21, %s1716_s21 }
0x15b7   :  { %p1723_p8 = por %p1722_p7, %p1721_p6 }
0x15b9   :  { %p1724_p9 = pnand %p1723_p8, %p1717_p5 }
0x15bb   :  { %1727 = shalt.err (!%p1724_p9)
}
0x15bc   :  { %1421 = dma.vmem_to_hbm [thread:$0]  %s1419_s1, 32, %s2100_s10, [#allocation7]   ;;  %v1456_v39 = vld [vmem:[%s2095_s5] ss:$0 sm:$0xff]  ;;  %v1298_v47 = vsub.s32 0, %v1847_v10  ;;  %v1347_v48 = vsub.s32 1, %v1847_v10 }
0x15bd   :  { %vm1328_vm3 = vcmask 1041409   ;;  %vm1330_vm4 = vcmask 1042434   ;;  %vm1332_vm5 = vcmask 1043459   ;;  %vm1388_vm6 = vcmask 122880   ;;  %s1768_s5 = smov [#allocation4]  }
0x15be   :  { %vm1334_vm7 = vcmask 1044484   ;;  %vm1336_vm8 = vcmask 1045509   ;;  %vm1338_vm9 = vcmask 1046534   ;;  %vm1340_vm10 = vcmask 1047559   ;;  %s1395_s9 = sshll.u32 %s1768_s5, 4  ;;  %s1396_s9 = int_to_ptr.vmem [resolvable:$true] %s1395_s9 }
0x15bf   :  { %vm1386_vm11 = vcmask 130049   ;;  %vm1343_vm12 = vcmask 130048   ;;  %s1736_s10 = scalar_lea.vmem %s1396_s9, 256  ;;  %p1741_p11 = scmp.lt.s32.totalorder %s1396_s9, %s1396_s9 }
0x15c0   :  { %p1737_p10 = scmp.ne.s32.totalorder %s1396_s9, %s1736_s10  ;;  %p1742_p12 = scmp.lt.s32.totalorder %s1736_s10, %s1736_s10 }
0x15c2   :  { %p1743_p13 = por %p1742_p12, %p1741_p11 }
0x15c4   :  { %p1744_p0 = pnand %p1743_p13, %p1737_p10 }
0x166f   :  { %v1620_v40 = vpop.f32.mrf.mxu1 }
0x1670   :  { %v1257_v41 = vadd.f32 %v1620_v40, %v1456_v39 }
0x1671   :  { %v1251_v42 = vpop.f32.mrf.mxu1 }
0x1672   :  { %v1279_v43 = vcombine.high %v1257_v41, %v1257_v41  ;;  %v1252_v44 = vadd.f32 %v1456_v39, %v1251_v42  ;;  %v1286_v45 = vrot.slane %v1257_v41, %v1878_v23 }
0x1674   :  { %v1293_v46 = vrot.slane %v1279_v43, %v1878_v23  ;;  %v1262_v49 = vcombine.high %v1252_v44, %v1252_v44  ;;  %v1269_v50 = vrot.slane %v1252_v44, %v1878_v23  ;;  %v1294_v54 = vcombine.high %v1286_v45, %v1286_v45 }
0x1675   :  { %v1315_v1 = vrot.slane %v1286_v45, %v1298_v47  ;;  %v1364_v2 = vrot.slane %v1286_v45, %v1347_v48 }
0x1676   :  { %v1295_v51 = vcombine.high %v1293_v46, %v1293_v46  ;;  %v1276_v52 = vrot.slane %v1262_v49, %v1878_v23  ;;  %v1277_v53 = vcombine.high %v1269_v50, %v1269_v50  ;;  %v1299_v55 = vrot.slane %v1269_v50, %v1298_v47 }
0x1677   :  { %v1348_v56 = vrot.slane %v1269_v50, %v1347_v48  ;;  %v1319_v5 = vrot.slane %v1294_v54, %v1298_v47  ;;  %v1368_v6 = vrot.slane %v1294_v54, %v1347_v48  ;;  %v1323_v9 = vrot.slane %v1293_v46, %v1298_v47 }
0x1678   :  { %v1376_v57 = vrot.slane %v1295_v51, %v1347_v48  ;;  %v1278_v58 = vcombine.high %v1276_v52, %v1276_v52  ;;  %v1303_v59 = vrot.slane %v1277_v53, %v1298_v47  ;;  %v1307_v10 = vrot.slane %v1276_v52, %v1298_v47 }
0x1679   :  { %v1352_v60 = vrot.slane %v1277_v53, %v1347_v48  ;;  %v1356_v61 = vrot.slane %v1276_v52, %v1347_v48  ;;  %v1372_v13 = vrot.slane %v1293_v46, %v1347_v48  ;;  %v1327_v16 = vrot.slane %v1295_v51, %v1298_v47 }
0x167a   :  { %1389 = vst.msk [vmem:[#allocation4 + $0xf] sm:$0x1] %vm1388_vm6, %v1376_v57  ;;  %v1311_v62 = vrot.slane %v1278_v58, %v1298_v47  ;;  %v1329_v23 = vsel %vm1328_vm3, %v1303_v59, %v1299_v55  ;;  %v1360_v63 = vrot.slane %v1278_v58, %v1347_v48 }
0x167b   :  { %v1377_v0 = vsel %vm1330_vm4, %v1352_v60, %v1348_v56  ;;  %v1331_v3 = vsel %vm1330_vm4, %v1307_v10, %v1329_v23 }
0x167c   :  { %v1378_v4 = vsel %vm1332_vm5, %v1356_v61, %v1377_v0  ;;  %v1333_v7 = vsel %vm1332_vm5, %v1311_v62, %v1331_v3 }
0x167d   :  { %v1379_v8 = vsel %vm1334_vm7, %v1360_v63, %v1378_v4  ;;  %v1335_v14 = vsel %vm1334_vm7, %v1315_v1, %v1333_v7 }
0x167e   :  { %v1380_v15 = vsel %vm1336_vm8, %v1364_v2, %v1379_v8  ;;  %v1337_v17 = vsel %vm1336_vm8, %v1319_v5, %v1335_v14 }
0x167f   :  { %v1381_v18 = vsel %vm1338_vm9, %v1368_v6, %v1380_v15  ;;  %v1339_v19 = vsel %vm1338_vm9, %v1323_v9, %v1337_v17 }
0x1680   :  { %v1382_v20 = vsel %vm1340_vm10, %v1372_v13, %v1381_v18  ;;  %v1341_v21 = vsel %vm1340_vm10, %v1327_v16, %v1339_v19 }
0x1681   :  { %1387 = vst.msk [vmem:[#allocation4 + $0x7] sm:$0xfe] %vm1386_vm11, %v1382_v20 }
0x1682   :  { %1344 = vst.msk [vmem:[#allocation4] sm:$0xff] %vm1343_vm12, %v1341_v21 }
0x1683   :  { %1747 = shalt.err (!%p1744_p0)
}
0x1684   :  { %s1769_s3 = smov 128   ;;  %s1770_s6 = smov 8  }
0x1685   :  { %1401 = dma.vmem_to_hbm [thread:$0]  %s1396_s9, 256, %s2098_s8, [#allocation5], %s1769_s3, %s1769_s3, %s1770_s6  }
0x1686   :  { %1756 = dma.done.wait [#allocation5], 256  }
0x1687   :  { %1757 = vsyncadd [#allocation5], 4294967040 }
0x1688   :  { %1758 = dma.done.wait [#allocation7], 64  }
0x1689   :  { %1759 = vsyncadd [#allocation7], 4294967232 }
0x168a   :  { %1431 = vsyncpa [#allocation5], 1 }
0x168b   :  { %1432 = vsyncpa [#allocation7], 1 }

</bundles_post_ra>
